<compile_context>
chip_gen: v7x
topology: tpu7x:2x2x1
jax: 0.10.0
libtpu: 0.0.40
codegen_flags: <defaults>
</compile_context>

<pallas_src>
import functools

import jax
import jax.numpy as jnp
from jax import lax
from jax.experimental import pallas as pl
from jax.experimental.pallas import tpu as pltpu


def _round_up(x, m):
    return (x + m - 1) // m * m


def _const_spec(block_shape, index_map):
    """BlockSpec for operands whose block index never changes (weights/biases).

    Single-buffers them when this JAX build supports pipeline_mode (a second
    buffer for a never-changing block is pure VMEM waste at production sizes).
    """
    try:
        return pl.BlockSpec(block_shape, index_map, pipeline_mode=pl.Buffered(1))
    except (TypeError, AttributeError):   # older JAX without pipeline_mode/Buffered
        return pl.BlockSpec(block_shape, index_map)


# ---------------------------------------------------------------------------
# Fused kernel: ReLU + input projection (chunk prologue) + GRU recurrence
# ---------------------------------------------------------------------------
def _gru_fused_kernel(x_ref, h0_ref, wih_ref, whh_ref, bih_ref, bhh_ref,
                      out_ref, h_scratch):
    # x_ref  : (Bs, Tc, E)    raw (pre-ReLU) inputs for this time chunk
    # h0_ref : (Bs, 1, H)     initial hidden state for this batch shard
    # wih_ref: (E, 3H)  whh_ref: (H, 3H)   gate order along lanes: [r | z | n]
    # bih_ref: (1, 3H)  bhh_ref: (1, 3H)
    # out_ref: (Bs, Tc, H)    per-chunk output slab (single whole-block store)
    # h_scratch: (Bs, H)      hidden-state carry across time chunks
    j = pl.program_id(1)                       # time-chunk index (sequential)
    Bs, Tc, E = x_ref.shape
    H = out_ref.shape[2]

    @pl.when(j == 0)
    def _():
        h_scratch[...] = h0_ref[:, 0, :]

    # ---- fused input projection for the whole chunk: one big MXU matmul ----
    x = jnp.maximum(x_ref[...], 0.0)                        # nn.ReLU
    gi = (jnp.dot(x.reshape(Bs * Tc, E), wih_ref[...],
                  preferred_element_type=jnp.float32)
          + bih_ref[...]).reshape(Bs, Tc, 3 * H)

    whh = whh_ref[...]                                      # hoisted constant loads
    bhh = bhh_ref[...]

    # ---- sequential recurrence: ONE (Bs,H)@(H,3H) dot per timestep ----------
    h = h_scratch[...]                                      # (Bs, H)
    hs = []
    for tau in range(Tc):                                   # fully unrolled (Tc <= 64)
        gh = jnp.dot(h, whh, preferred_element_type=jnp.float32) + bhh
        gi_t = gi[:, tau, :]
        r = jax.nn.sigmoid(gi_t[:, :H] + gh[:, :H])
        z = jax.nn.sigmoid(gi_t[:, H:2 * H] + gh[:, H:2 * H])
        n = jnp.tanh(gi_t[:, 2 * H:] + r * gh[:, 2 * H:])
        h = (1.0 - z) * n + z * h
        hs.append(h)

    out_ref[...] = jnp.stack(hs, axis=1)                    # one whole-block store
    h_scratch[...] = h


# ---------------------------------------------------------------------------
# Wrapper
# ---------------------------------------------------------------------------
def _vmem_limit_bytes(Bs, Tc, E, H):
    """Derive the scoped-VMEM request from the actual block sizes (+ headroom)."""
    f32 = 4
    blocks = (2 * Bs * Tc * E                       # x chunk (double-buffered)
              + 2 * Bs * Tc * H                     # out chunk (double-buffered)
              + 2 * Bs * H                          # h0
              + 2 * (E * 3 * H + H * 3 * H + 2 * 3 * H)  # weights/biases
              + Bs * H) * f32                       # h carry scratch
    # 8x headroom for unrolled-loop temporaries / relayouts; clamp to the default
    # scoped limit so it is also safe on v7x (64 MiB physical VMEM).
    return int(min(max(8 * blocks, 8 << 20), 32 << 20))


def prepare_encode_params(params):
    """One-time (per model load) repack of PyTorch GRU parameters.

    Gates stay concatenated along the lane axis in PyTorch's [r | z | n] order,
    pre-transposed so the kernel does plain `x @ W` -- no per-call transposes.
    """
    w_ih, w_hh, b_ih, b_hh = params                 # (3H,E), (3H,H), (3H,), (3H,)
    three_h = w_ih.shape[0]
    wih_t = jnp.transpose(w_ih).astype(jnp.float32)          # (E, 3H)
    whh_t = jnp.transpose(w_hh).astype(jnp.float32)          # (H, 3H)
    bih = b_ih.reshape(1, three_h).astype(jnp.float32)       # (1, 3H)
    bhh = b_hh.reshape(1, three_h).astype(jnp.float32)       # (1, 3H)
    return wih_t, whh_t, bih, bhh


@functools.partial(jax.jit, static_argnums=(6, 7))
def _encode_forward_impl(x, hidden, wih_t, whh_t, bih, bhh, nb, Tc):
    B, T, E = x.shape
    H = whh_t.shape[0]
    Bs = B // nb
    T_pad = _round_up(max(T, 1), Tc)
    n_chunks = T_pad // Tc

    x = x.astype(jnp.float32)                        # batch-first, no transpose
    if T_pad != T:
        # Padded steps see relu(0)@W + b_ih; they only produce rows >= T which
        # are sliced away below, so correctness is unaffected.
        x = jnp.pad(x, ((0, 0), (0, T_pad - T), (0, 0)))

    # (1, B, H) -> (B, 1, H): keeps the batch-shard axis out of the block's
    # last-two (sublane/lane) dims so Bs never needs to be 8-aligned.
    h0_b = jnp.transpose(hidden, (1, 0, 2)).astype(jnp.float32)

    out = pl.pallas_call(
        _gru_fused_kernel,
        out_shape=jax.ShapeDtypeStruct((B, T_pad, H), jnp.float32),
        grid_spec=pltpu.PrefetchScalarGridSpec(
            num_scalar_prefetch=0,
            grid=(nb, n_chunks),                     # (batch shards, time chunks)
            in_specs=[
                pl.BlockSpec((Bs, Tc, E), lambda c, j: (c, j, 0)),
                pl.BlockSpec((Bs, 1, H), lambda c, j: (c, 0, 0)),
                _const_spec((E, 3 * H), lambda c, j: (0, 0)),
                _const_spec((H, 3 * H), lambda c, j: (0, 0)),
                _const_spec((1, 3 * H), lambda c, j: (0, 0)),
                _const_spec((1, 3 * H), lambda c, j: (0, 0)),
            ],
            out_specs=pl.BlockSpec((Bs, Tc, H), lambda c, j: (c, j, 0)),
            scratch_shapes=[pltpu.VMEM((Bs, H), jnp.float32)],
        ),
        compiler_params=pltpu.CompilerParams(
            # batch shards are independent (megacore split on v7x); time chunks
            # carry the hidden state and must stay sequential.
            dimension_semantics=("parallel", "arbitrary"),
            vmem_limit_bytes=_vmem_limit_bytes(Bs, Tc, E, H),
        ),
    )(x, h0_b, wih_t, whh_t, bih, bhh)

    output = out[:, :T, :]                                   # (B, T, H)
    # Final hidden state == last valid output row (no per-step h_n store).
    h_n = jnp.transpose(output[:, T - 1:T, :], (1, 0, 2))    # (1, B, H)
    return output, h_n


def _num_batch_shards(B):
    """Split the (independent) per-batch recurrences across v7x's 2 TensorCores."""
    if B % 2 != 0:
        return 1
    try:
        kind = jax.devices()[0].device_kind.lower()
    except Exception:
        return 1
    return 2 if ("v7" in kind or "7x" in kind) else 1


def encode_model_forward(embed_text, length, hidden, prepared_params):
    """embed_text: (B, T, E); length: (B,) (unused); hidden: (1, B, H)."""
    del length   # forward() never packs the sequence; lengths are unused.
    B, T, _ = embed_text.shape
    nb = _num_batch_shards(B)
    # Time chunk: 8-aligned, large enough to amortize the ~0.35us/grid-step
    # overhead, small enough that the fully-unrolled in-kernel loop stays cheap.
    Tc = min(_round_up(T, 8), 64)
    return _encode_forward_impl(embed_text, hidden, *prepared_params, nb, Tc)


def _reference_forward(embed_text, hidden, params):
    """Pure-JAX reference matching torch.nn.GRU semantics (for verification)."""
    w_ih, w_hh, b_ih, b_hh = params
    H = hidden.shape[-1]
    x = jnp.maximum(embed_text, 0.0)

    def step(h, x_t):
        gi = x_t @ w_ih.T + b_ih
        gh = h @ w_hh.T + b_hh
        i_r, i_z, i_n = gi[:, :H], gi[:, H:2 * H], gi[:, 2 * H:]
        h_r, h_z, h_n = gh[:, :H], gh[:, H:2 * H], gh[:, 2 * H:]
        r = jax.nn.sigmoid(i_r + h_r)
        z = jax.nn.sigmoid(i_z + h_z)
        n = jnp.tanh(i_n + r * h_n)
        h_new = (1.0 - z) * n + z * h
        return h_new, h_new

    h_last, outs = lax.scan(step, hidden[0], jnp.transpose(x, (1, 0, 2)))
    return jnp.transpose(outs, (1, 0, 2)), h_last[None]


if __name__ == "__main__":
    # Small shapes implied by the module: embed_dim=E=32, hidden_dim=H=32.
    B, T, E, H = 2, 8, 32, 32

    key = jax.random.PRNGKey(0)
    k_x, k_h, k1, k2, k3, k4 = jax.random.split(key, 6)

    embed_text = jax.random.normal(k_x, (B, T, E), dtype=jnp.float32)
    length = jnp.full((B,), T, dtype=jnp.int32)      # unused (no packing in forward)
    hidden = jax.random.normal(k_h, (1, B, H), dtype=jnp.float32)

    # PyTorch-style uniform(-1/sqrt(H), 1/sqrt(H)) GRU parameters.
    bound = 1.0 / jnp.sqrt(jnp.float32(H))
    w_ih = jax.random.uniform(k1, (3 * H, E), jnp.float32, -bound, bound)
    w_hh = jax.random.uniform(k2, (3 * H, H), jnp.float32, -bound, bound)
    b_ih = jax.random.uniform(k3, (3 * H,), jnp.float32, -bound, bound)
    b_hh = jax.random.uniform(k4, (3 * H,), jnp.float32, -bound, bound)
    params = (w_ih, w_hh, b_ih, b_hh)

    prepared = prepare_encode_params(params)         # one-time weight repack

    output, h_n = encode_model_forward(embed_text, length, hidden, prepared)
    output = jax.block_until_ready(output)
    h_n = jax.block_until_ready(h_n)

    assert output.shape == (B, T, H) and h_n.shape == (1, B, H)

    ref_out, ref_hn = _reference_forward(embed_text, hidden, params)
    assert jnp.allclose(output, ref_out, rtol=1e-3, atol=1e-3), (
        float(jnp.max(jnp.abs(output - ref_out))))
    assert jnp.allclose(h_n, ref_hn, rtol=1e-3, atol=1e-3)

    print("KERNEL_OK")
</pallas_src>

<mosaic_0001>
module attributes {stable_mosaic.version = 11 : i64} {
  func.func @_gru_fused_kernel(%arg0: i32, %arg1: i32, %arg2: memref<2x8x32xf32, #tpu.memory_space<vmem>>, %arg3: memref<2x1x32xf32, #tpu.memory_space<vmem>>, %arg4: memref<32x96xf32, #tpu.memory_space<vmem>>, %arg5: memref<32x96xf32, #tpu.memory_space<vmem>>, %arg6: memref<1x96xf32, #tpu.memory_space<vmem>>, %arg7: memref<1x96xf32, #tpu.memory_space<vmem>>, %arg8: memref<2x8x32xf32, #tpu.memory_space<vmem>>, %arg9: memref<2x32xf32, #tpu.memory_space<vmem>>) attributes {dimension_semantics = [#tpu.dimension_semantics<parallel>, #tpu.dimension_semantics<arbitrary>], iteration_bounds = array<i64: 1, 1>, scalar_prefetch = 0 : i64, scratch_operands = 1 : i64, tpu.core_type = #tpu.core_type<tc>, window_params = [{transform_indices = @transform_0, window_bounds = array<i64: 2, 8, 32>}, {transform_indices = @transform_1, window_bounds = array<i64: 2, 1, 32>}, {pipeline_mode = #tpu.pipeline_mode<synchronous>, transform_indices = @transform_2, window_bounds = array<i64: 32, 96>}, {pipeline_mode = #tpu.pipeline_mode<synchronous>, transform_indices = @transform_3, window_bounds = array<i64: 32, 96>}, {pipeline_mode = #tpu.pipeline_mode<synchronous>, transform_indices = @transform_4, window_bounds = array<i64: 1, 96>}, {pipeline_mode = #tpu.pipeline_mode<synchronous>, transform_indices = @transform_5, window_bounds = array<i64: 1, 96>}, {transform_indices = @transform_6, window_bounds = array<i64: 2, 8, 32>}]} {
    %c0_i32 = arith.constant 0 : i32
    %0 = arith.cmpi eq, %arg1, %c0_i32 : i32
    %1 = arith.extui %0 : i1 to i32
    %c0_i32_0 = arith.constant 0 : i32
    %2 = arith.cmpi ne, %1, %c0_i32_0 : i32
    scf.if %2 {
      %c0_51 = arith.constant 0 : index
      %c0_52 = arith.constant 0 : index
      %c0_53 = arith.constant 0 : index
      %275 = vector.load %arg3[%c0_51, %c0_52, %c0_53] : memref<2x1x32xf32, #tpu.memory_space<vmem>>, vector<2x1x32xf32>
      %276 = vector.shape_cast %275 : vector<2x1x32xf32> to vector<2x32xf32>
      %c0_54 = arith.constant 0 : index
      %c0_55 = arith.constant 0 : index
      %277 = vector.load %arg9[%c0_54, %c0_55] : memref<2x32xf32, #tpu.memory_space<vmem>>, vector<2x32xf32>
      tpu.vector_store %arg9[%c0_54, %c0_55], %276 {strides = array<i32>} : memref<2x32xf32, #tpu.memory_space<vmem>>, vector<2x32xf32>,
    } else {
    }
    %c0 = arith.constant 0 : index
    %c0_1 = arith.constant 0 : index
    %c0_2 = arith.constant 0 : index
    %3 = vector.load %arg2[%c0, %c0_1, %c0_2] : memref<2x8x32xf32, #tpu.memory_space<vmem>>, vector<2x8x32xf32>
    %cst = arith.constant 0.000000e+00 : f32
    %4 = vector.broadcast %cst : f32 to vector<2x8x32xf32>
    %5 = arith.maximumf %3, %4 : vector<2x8x32xf32>
    %6 = vector.shape_cast %5 : vector<2x8x32xf32> to vector<16x32xf32>
    %c0_3 = arith.constant 0 : index
    %c0_4 = arith.constant 0 : index
    %7 = vector.load %arg4[%c0_3, %c0_4] : memref<32x96xf32, #tpu.memory_space<vmem>>, vector<32x96xf32>
    %cst_5 = arith.constant dense<0.000000e+00> : vector<16x96xf32>
    %8 = tpu.matmul %6, %7, %cst_5 {dimension_numbers = #tpu.dot_dimension_numbers<[1], [0], [0], [1], [0, 0, 1, 1], [], []>} : vector<16x32xf32>, vector<32x96xf32>, vector<16x96xf32> -> vector<16x96xf32>
    %c0_6 = arith.constant 0 : index
    %c0_7 = arith.constant 0 : index
    %9 = vector.load %arg6[%c0_6, %c0_7] : memref<1x96xf32, #tpu.memory_space<vmem>>, vector<1x96xf32>
    %10 = vector.broadcast %9 : vector<1x96xf32> to vector<16x96xf32>
    %11 = arith.addf %8, %10 : vector<16x96xf32>
    %12 = vector.shape_cast %11 : vector<16x96xf32> to vector<2x8x96xf32>
    %c0_8 = arith.constant 0 : index
    %c0_9 = arith.constant 0 : index
    %13 = vector.load %arg5[%c0_8, %c0_9] : memref<32x96xf32, #tpu.memory_space<vmem>>, vector<32x96xf32>
    %c0_10 = arith.constant 0 : index
    %c0_11 = arith.constant 0 : index
    %14 = vector.load %arg7[%c0_10, %c0_11] : memref<1x96xf32, #tpu.memory_space<vmem>>, vector<1x96xf32>
    %c0_12 = arith.constant 0 : index
    %c0_13 = arith.constant 0 : index
    %15 = vector.load %arg9[%c0_12, %c0_13] : memref<2x32xf32, #tpu.memory_space<vmem>>, vector<2x32xf32>
    %cst_14 = arith.constant dense<0.000000e+00> : vector<2x96xf32>
    %16 = tpu.matmul %15, %13, %cst_14 {dimension_numbers = #tpu.dot_dimension_numbers<[1], [0], [0], [1], [0, 0, 1, 1], [], []>} : vector<2x32xf32>, vector<32x96xf32>, vector<2x96xf32> -> vector<2x96xf32>
    %17 = vector.broadcast %14 : vector<1x96xf32> to vector<2x96xf32>
    %18 = arith.addf %16, %17 : vector<2x96xf32>
    %19 = vector.extract_strided_slice %12 {offsets = [0, 0, 0], sizes = [2, 1, 96], strides = [1, 1, 1]} : vector<2x8x96xf32> to vector<2x1x96xf32>
    %20 = vector.shape_cast %19 : vector<2x1x96xf32> to vector<2x96xf32>
    %21 = vector.extract_strided_slice %20 {offsets = [0, 0], sizes = [2, 32], strides = [1, 1]} : vector<2x96xf32> to vector<2x32xf32>
    %22 = vector.extract_strided_slice %18 {offsets = [0, 0], sizes = [2, 32], strides = [1, 1]} : vector<2x96xf32> to vector<2x32xf32>
    %23 = arith.addf %21, %22 : vector<2x32xf32>
    %24 = arith.negf %23 : vector<2x32xf32>
    %25 = math.exp %24 : vector<2x32xf32>
    %cst_15 = arith.constant 1.000000e+00 : f32
    %26 = vector.broadcast %cst_15 : f32 to vector<2x32xf32>
    %27 = arith.addf %26, %25 : vector<2x32xf32>
    %28 = arith.divf %26, %27 : vector<2x32xf32>
    %29 = vector.extract_strided_slice %20 {offsets = [0, 32], sizes = [2, 32], strides = [1, 1]} : vector<2x96xf32> to vector<2x32xf32>
    %30 = vector.extract_strided_slice %18 {offsets = [0, 32], sizes = [2, 32], strides = [1, 1]} : vector<2x96xf32> to vector<2x32xf32>
    %31 = arith.addf %29, %30 : vector<2x32xf32>
    %32 = arith.negf %31 : vector<2x32xf32>
    %33 = math.exp %32 : vector<2x32xf32>
    %cst_16 = arith.constant 1.000000e+00 : f32
    %34 = vector.broadcast %cst_16 : f32 to vector<2x32xf32>
    %35 = arith.addf %34, %33 : vector<2x32xf32>
    %36 = arith.divf %34, %35 : vector<2x32xf32>
    %37 = vector.extract_strided_slice %20 {offsets = [0, 64], sizes = [2, 32], strides = [1, 1]} : vector<2x96xf32> to vector<2x32xf32>
    %38 = vector.extract_strided_slice %18 {offsets = [0, 64], sizes = [2, 32], strides = [1, 1]} : vector<2x96xf32> to vector<2x32xf32>
    %39 = arith.mulf %28, %38 : vector<2x32xf32>
    %40 = arith.addf %37, %39 : vector<2x32xf32>
    %41 = math.tanh %40 : vector<2x32xf32>
    %cst_17 = arith.constant 1.000000e+00 : f32
    %42 = vector.broadcast %cst_17 : f32 to vector<2x32xf32>
    %43 = arith.subf %42, %36 : vector<2x32xf32>
    %44 = arith.mulf %43, %41 : vector<2x32xf32>
    %45 = arith.mulf %36, %15 : vector<2x32xf32>
    %46 = arith.addf %44, %45 : vector<2x32xf32>
    %cst_18 = arith.constant dense<0.000000e+00> : vector<2x96xf32>
    %47 = tpu.matmul %46, %13, %cst_18 {dimension_numbers = #tpu.dot_dimension_numbers<[1], [0], [0], [1], [0, 0, 1, 1], [], []>} : vector<2x32xf32>, vector<32x96xf32>, vector<2x96xf32> -> vector<2x96xf32>
    %48 = vector.broadcast %14 : vector<1x96xf32> to vector<2x96xf32>
    %49 = arith.addf %47, %48 : vector<2x96xf32>
    %50 = vector.extract_strided_slice %12 {offsets = [0, 1, 0], sizes = [2, 1, 96], strides = [1, 1, 1]} : vector<2x8x96xf32> to vector<2x1x96xf32>
    %51 = vector.shape_cast %50 : vector<2x1x96xf32> to vector<2x96xf32>
    %52 = vector.extract_strided_slice %51 {offsets = [0, 0], sizes = [2, 32], strides = [1, 1]} : vector<2x96xf32> to vector<2x32xf32>
    %53 = vector.extract_strided_slice %49 {offsets = [0, 0], sizes = [2, 32], strides = [1, 1]} : vector<2x96xf32> to vector<2x32xf32>
    %54 = arith.addf %52, %53 : vector<2x32xf32>
    %55 = arith.negf %54 : vector<2x32xf32>
    %56 = math.exp %55 : vector<2x32xf32>
    %cst_19 = arith.constant 1.000000e+00 : f32
    %57 = vector.broadcast %cst_19 : f32 to vector<2x32xf32>
    %58 = arith.addf %57, %56 : vector<2x32xf32>
    %59 = arith.divf %57, %58 : vector<2x32xf32>
    %60 = vector.extract_strided_slice %51 {offsets = [0, 32], sizes = [2, 32], strides = [1, 1]} : vector<2x96xf32> to vector<2x32xf32>
    %61 = vector.extract_strided_slice %49 {offsets = [0, 32], sizes = [2, 32], strides = [1, 1]} : vector<2x96xf32> to vector<2x32xf32>
    %62 = arith.addf %60, %61 : vector<2x32xf32>
    %63 = arith.negf %62 : vector<2x32xf32>
    %64 = math.exp %63 : vector<2x32xf32>
    %cst_20 = arith.constant 1.000000e+00 : f32
    %65 = vector.broadcast %cst_20 : f32 to vector<2x32xf32>
    %66 = arith.addf %65, %64 : vector<2x32xf32>
    %67 = arith.divf %65, %66 : vector<2x32xf32>
    %68 = vector.extract_strided_slice %51 {offsets = [0, 64], sizes = [2, 32], strides = [1, 1]} : vector<2x96xf32> to vector<2x32xf32>
    %69 = vector.extract_strided_slice %49 {offsets = [0, 64], sizes = [2, 32], strides = [1, 1]} : vector<2x96xf32> to vector<2x32xf32>
    %70 = arith.mulf %59, %69 : vector<2x32xf32>
    %71 = arith.addf %68, %70 : vector<2x32xf32>
    %72 = math.tanh %71 : vector<2x32xf32>
    %cst_21 = arith.constant 1.000000e+00 : f32
    %73 = vector.broadcast %cst_21 : f32 to vector<2x32xf32>
    %74 = arith.subf %73, %67 : vector<2x32xf32>
    %75 = arith.mulf %74, %72 : vector<2x32xf32>
    %76 = arith.mulf %67, %46 : vector<2x32xf32>
    %77 = arith.addf %75, %76 : vector<2x32xf32>
    %cst_22 = arith.constant dense<0.000000e+00> : vector<2x96xf32>
    %78 = tpu.matmul %77, %13, %cst_22 {dimension_numbers = #tpu.dot_dimension_numbers<[1], [0], [0], [1], [0, 0, 1, 1], [], []>} : vector<2x32xf32>, vector<32x96xf32>, vector<2x96xf32> -> vector<2x96xf32>
    %79 = vector.broadcast %14 : vector<1x96xf32> to vector<2x96xf32>
    %80 = arith.addf %78, %79 : vector<2x96xf32>
    %81 = vector.extract_strided_slice %12 {offsets = [0, 2, 0], sizes = [2, 1, 96], strides = [1, 1, 1]} : vector<2x8x96xf32> to vector<2x1x96xf32>
    %82 = vector.shape_cast %81 : vector<2x1x96xf32> to vector<2x96xf32>
    %83 = vector.extract_strided_slice %82 {offsets = [0, 0], sizes = [2, 32], strides = [1, 1]} : vector<2x96xf32> to vector<2x32xf32>
    %84 = vector.extract_strided_slice %80 {offsets = [0, 0], sizes = [2, 32], strides = [1, 1]} : vector<2x96xf32> to vector<2x32xf32>
    %85 = arith.addf %83, %84 : vector<2x32xf32>
    %86 = arith.negf %85 : vector<2x32xf32>
    %87 = math.exp %86 : vector<2x32xf32>
    %cst_23 = arith.constant 1.000000e+00 : f32
    %88 = vector.broadcast %cst_23 : f32 to vector<2x32xf32>
    %89 = arith.addf %88, %87 : vector<2x32xf32>
    %90 = arith.divf %88, %89 : vector<2x32xf32>
    %91 = vector.extract_strided_slice %82 {offsets = [0, 32], sizes = [2, 32], strides = [1, 1]} : vector<2x96xf32> to vector<2x32xf32>
    %92 = vector.extract_strided_slice %80 {offsets = [0, 32], sizes = [2, 32], strides = [1, 1]} : vector<2x96xf32> to vector<2x32xf32>
    %93 = arith.addf %91, %92 : vector<2x32xf32>
    %94 = arith.negf %93 : vector<2x32xf32>
    %95 = math.exp %94 : vector<2x32xf32>
    %cst_24 = arith.constant 1.000000e+00 : f32
    %96 = vector.broadcast %cst_24 : f32 to vector<2x32xf32>
    %97 = arith.addf %96, %95 : vector<2x32xf32>
    %98 = arith.divf %96, %97 : vector<2x32xf32>
    %99 = vector.extract_strided_slice %82 {offsets = [0, 64], sizes = [2, 32], strides = [1, 1]} : vector<2x96xf32> to vector<2x32xf32>
    %100 = vector.extract_strided_slice %80 {offsets = [0, 64], sizes = [2, 32], strides = [1, 1]} : vector<2x96xf32> to vector<2x32xf32>
    %101 = arith.mulf %90, %100 : vector<2x32xf32>
    %102 = arith.addf %99, %101 : vector<2x32xf32>
    %103 = math.tanh %102 : vector<2x32xf32>
    %cst_25 = arith.constant 1.000000e+00 : f32
    %104 = vector.broadcast %cst_25 : f32 to vector<2x32xf32>
    %105 = arith.subf %104, %98 : vector<2x32xf32>
    %106 = arith.mulf %105, %103 : vector<2x32xf32>
    %107 = arith.mulf %98, %77 : vector<2x32xf32>
    %108 = arith.addf %106, %107 : vector<2x32xf32>
    %cst_26 = arith.constant dense<0.000000e+00> : vector<2x96xf32>
    %109 = tpu.matmul %108, %13, %cst_26 {dimension_numbers = #tpu.dot_dimension_numbers<[1], [0], [0], [1], [0, 0, 1, 1], [], []>} : vector<2x32xf32>, vector<32x96xf32>, vector<2x96xf32> -> vector<2x96xf32>
    %110 = vector.broadcast %14 : vector<1x96xf32> to vector<2x96xf32>
    %111 = arith.addf %109, %110 : vector<2x96xf32>
    %112 = vector.extract_strided_slice %12 {offsets = [0, 3, 0], sizes = [2, 1, 96], strides = [1, 1, 1]} : vector<2x8x96xf32> to vector<2x1x96xf32>
    %113 = vector.shape_cast %112 : vector<2x1x96xf32> to vector<2x96xf32>
    %114 = vector.extract_strided_slice %113 {offsets = [0, 0], sizes = [2, 32], strides = [1, 1]} : vector<2x96xf32> to vector<2x32xf32>
    %115 = vector.extract_strided_slice %111 {offsets = [0, 0], sizes = [2, 32], strides = [1, 1]} : vector<2x96xf32> to vector<2x32xf32>
    %116 = arith.addf %114, %115 : vector<2x32xf32>
    %117 = arith.negf %116 : vector<2x32xf32>
    %118 = math.exp %117 : vector<2x32xf32>
    %cst_27 = arith.constant 1.000000e+00 : f32
    %119 = vector.broadcast %cst_27 : f32 to vector<2x32xf32>
    %120 = arith.addf %119, %118 : vector<2x32xf32>
    %121 = arith.divf %119, %120 : vector<2x32xf32>
    %122 = vector.extract_strided_slice %113 {offsets = [0, 32], sizes = [2, 32], strides = [1, 1]} : vector<2x96xf32> to vector<2x32xf32>
    %123 = vector.extract_strided_slice %111 {offsets = [0, 32], sizes = [2, 32], strides = [1, 1]} : vector<2x96xf32> to vector<2x32xf32>
    %124 = arith.addf %122, %123 : vector<2x32xf32>
    %125 = arith.negf %124 : vector<2x32xf32>
    %126 = math.exp %125 : vector<2x32xf32>
    %cst_28 = arith.constant 1.000000e+00 : f32
    %127 = vector.broadcast %cst_28 : f32 to vector<2x32xf32>
    %128 = arith.addf %127, %126 : vector<2x32xf32>
    %129 = arith.divf %127, %128 : vector<2x32xf32>
    %130 = vector.extract_strided_slice %113 {offsets = [0, 64], sizes = [2, 32], strides = [1, 1]} : vector<2x96xf32> to vector<2x32xf32>
    %131 = vector.extract_strided_slice %111 {offsets = [0, 64], sizes = [2, 32], strides = [1, 1]} : vector<2x96xf32> to vector<2x32xf32>
    %132 = arith.mulf %121, %131 : vector<2x32xf32>
    %133 = arith.addf %130, %132 : vector<2x32xf32>
    %134 = math.tanh %133 : vector<2x32xf32>
    %cst_29 = arith.constant 1.000000e+00 : f32
    %135 = vector.broadcast %cst_29 : f32 to vector<2x32xf32>
    %136 = arith.subf %135, %129 : vector<2x32xf32>
    %137 = arith.mulf %136, %134 : vector<2x32xf32>
    %138 = arith.mulf %129, %108 : vector<2x32xf32>
    %139 = arith.addf %137, %138 : vector<2x32xf32>
    %cst_30 = arith.constant dense<0.000000e+00> : vector<2x96xf32>
    %140 = tpu.matmul %139, %13, %cst_30 {dimension_numbers = #tpu.dot_dimension_numbers<[1], [0], [0], [1], [0, 0, 1, 1], [], []>} : vector<2x32xf32>, vector<32x96xf32>, vector<2x96xf32> -> vector<2x96xf32>
    %141 = vector.broadcast %14 : vector<1x96xf32> to vector<2x96xf32>
    %142 = arith.addf %140, %141 : vector<2x96xf32>
    %143 = vector.extract_strided_slice %12 {offsets = [0, 4, 0], sizes = [2, 1, 96], strides = [1, 1, 1]} : vector<2x8x96xf32> to vector<2x1x96xf32>
    %144 = vector.shape_cast %143 : vector<2x1x96xf32> to vector<2x96xf32>
    %145 = vector.extract_strided_slice %144 {offsets = [0, 0], sizes = [2, 32], strides = [1, 1]} : vector<2x96xf32> to vector<2x32xf32>
    %146 = vector.extract_strided_slice %142 {offsets = [0, 0], sizes = [2, 32], strides = [1, 1]} : vector<2x96xf32> to vector<2x32xf32>
    %147 = arith.addf %145, %146 : vector<2x32xf32>
    %148 = arith.negf %147 : vector<2x32xf32>
    %149 = math.exp %148 : vector<2x32xf32>
    %cst_31 = arith.constant 1.000000e+00 : f32
    %150 = vector.broadcast %cst_31 : f32 to vector<2x32xf32>
    %151 = arith.addf %150, %149 : vector<2x32xf32>
    %152 = arith.divf %150, %151 : vector<2x32xf32>
    %153 = vector.extract_strided_slice %144 {offsets = [0, 32], sizes = [2, 32], strides = [1, 1]} : vector<2x96xf32> to vector<2x32xf32>
    %154 = vector.extract_strided_slice %142 {offsets = [0, 32], sizes = [2, 32], strides = [1, 1]} : vector<2x96xf32> to vector<2x32xf32>
    %155 = arith.addf %153, %154 : vector<2x32xf32>
    %156 = arith.negf %155 : vector<2x32xf32>
    %157 = math.exp %156 : vector<2x32xf32>
    %cst_32 = arith.constant 1.000000e+00 : f32
    %158 = vector.broadcast %cst_32 : f32 to vector<2x32xf32>
    %159 = arith.addf %158, %157 : vector<2x32xf32>
    %160 = arith.divf %158, %159 : vector<2x32xf32>
    %161 = vector.extract_strided_slice %144 {offsets = [0, 64], sizes = [2, 32], strides = [1, 1]} : vector<2x96xf32> to vector<2x32xf32>
    %162 = vector.extract_strided_slice %142 {offsets = [0, 64], sizes = [2, 32], strides = [1, 1]} : vector<2x96xf32> to vector<2x32xf32>
    %163 = arith.mulf %152, %162 : vector<2x32xf32>
    %164 = arith.addf %161, %163 : vector<2x32xf32>
    %165 = math.tanh %164 : vector<2x32xf32>
    %cst_33 = arith.constant 1.000000e+00 : f32
    %166 = vector.broadcast %cst_33 : f32 to vector<2x32xf32>
    %167 = arith.subf %166, %160 : vector<2x32xf32>
    %168 = arith.mulf %167, %165 : vector<2x32xf32>
    %169 = arith.mulf %160, %139 : vector<2x32xf32>
    %170 = arith.addf %168, %169 : vector<2x32xf32>
    %cst_34 = arith.constant dense<0.000000e+00> : vector<2x96xf32>
    %171 = tpu.matmul %170, %13, %cst_34 {dimension_numbers = #tpu.dot_dimension_numbers<[1], [0], [0], [1], [0, 0, 1, 1], [], []>} : vector<2x32xf32>, vector<32x96xf32>, vector<2x96xf32> -> vector<2x96xf32>
    %172 = vector.broadcast %14 : vector<1x96xf32> to vector<2x96xf32>
    %173 = arith.addf %171, %172 : vector<2x96xf32>
    %174 = vector.extract_strided_slice %12 {offsets = [0, 5, 0], sizes = [2, 1, 96], strides = [1, 1, 1]} : vector<2x8x96xf32> to vector<2x1x96xf32>
    %175 = vector.shape_cast %174 : vector<2x1x96xf32> to vector<2x96xf32>
    %176 = vector.extract_strided_slice %175 {offsets = [0, 0], sizes = [2, 32], strides = [1, 1]} : vector<2x96xf32> to vector<2x32xf32>
    %177 = vector.extract_strided_slice %173 {offsets = [0, 0], sizes = [2, 32], strides = [1, 1]} : vector<2x96xf32> to vector<2x32xf32>
    %178 = arith.addf %176, %177 : vector<2x32xf32>
    %179 = arith.negf %178 : vector<2x32xf32>
    %180 = math.exp %179 : vector<2x32xf32>
    %cst_35 = arith.constant 1.000000e+00 : f32
    %181 = vector.broadcast %cst_35 : f32 to vector<2x32xf32>
    %182 = arith.addf %181, %180 : vector<2x32xf32>
    %183 = arith.divf %181, %182 : vector<2x32xf32>
    %184 = vector.extract_strided_slice %175 {offsets = [0, 32], sizes = [2, 32], strides = [1, 1]} : vector<2x96xf32> to vector<2x32xf32>
    %185 = vector.extract_strided_slice %173 {offsets = [0, 32], sizes = [2, 32], strides = [1, 1]} : vector<2x96xf32> to vector<2x32xf32>
    %186 = arith.addf %184, %185 : vector<2x32xf32>
    %187 = arith.negf %186 : vector<2x32xf32>
    %188 = math.exp %187 : vector<2x32xf32>
    %cst_36 = arith.constant 1.000000e+00 : f32
    %189 = vector.broadcast %cst_36 : f32 to vector<2x32xf32>
    %190 = arith.addf %189, %188 : vector<2x32xf32>
    %191 = arith.divf %189, %190 : vector<2x32xf32>
    %192 = vector.extract_strided_slice %175 {offsets = [0, 64], sizes = [2, 32], strides = [1, 1]} : vector<2x96xf32> to vector<2x32xf32>
    %193 = vector.extract_strided_slice %173 {offsets = [0, 64], sizes = [2, 32], strides = [1, 1]} : vector<2x96xf32> to vector<2x32xf32>
    %194 = arith.mulf %183, %193 : vector<2x32xf32>
    %195 = arith.addf %192, %194 : vector<2x32xf32>
    %196 = math.tanh %195 : vector<2x32xf32>
    %cst_37 = arith.constant 1.000000e+00 : f32
    %197 = vector.broadcast %cst_37 : f32 to vector<2x32xf32>
    %198 = arith.subf %197, %191 : vector<2x32xf32>
    %199 = arith.mulf %198, %196 : vector<2x32xf32>
    %200 = arith.mulf %191, %170 : vector<2x32xf32>
    %201 = arith.addf %199, %200 : vector<2x32xf32>
    %cst_38 = arith.constant dense<0.000000e+00> : vector<2x96xf32>
    %202 = tpu.matmul %201, %13, %cst_38 {dimension_numbers = #tpu.dot_dimension_numbers<[1], [0], [0], [1], [0, 0, 1, 1], [], []>} : vector<2x32xf32>, vector<32x96xf32>, vector<2x96xf32> -> vector<2x96xf32>
    %203 = vector.broadcast %14 : vector<1x96xf32> to vector<2x96xf32>
    %204 = arith.addf %202, %203 : vector<2x96xf32>
    %205 = vector.extract_strided_slice %12 {offsets = [0, 6, 0], sizes = [2, 1, 96], strides = [1, 1, 1]} : vector<2x8x96xf32> to vector<2x1x96xf32>
    %206 = vector.shape_cast %205 : vector<2x1x96xf32> to vector<2x96xf32>
    %207 = vector.extract_strided_slice %206 {offsets = [0, 0], sizes = [2, 32], strides = [1, 1]} : vector<2x96xf32> to vector<2x32xf32>
    %208 = vector.extract_strided_slice %204 {offsets = [0, 0], sizes = [2, 32], strides = [1, 1]} : vector<2x96xf32> to vector<2x32xf32>
    %209 = arith.addf %207, %208 : vector<2x32xf32>
    %210 = arith.negf %209 : vector<2x32xf32>
    %211 = math.exp %210 : vector<2x32xf32>
    %cst_39 = arith.constant 1.000000e+00 : f32
    %212 = vector.broadcast %cst_39 : f32 to vector<2x32xf32>
    %213 = arith.addf %212, %211 : vector<2x32xf32>
    %214 = arith.divf %212, %213 : vector<2x32xf32>
    %215 = vector.extract_strided_slice %206 {offsets = [0, 32], sizes = [2, 32], strides = [1, 1]} : vector<2x96xf32> to vector<2x32xf32>
    %216 = vector.extract_strided_slice %204 {offsets = [0, 32], sizes = [2, 32], strides = [1, 1]} : vector<2x96xf32> to vector<2x32xf32>
    %217 = arith.addf %215, %216 : vector<2x32xf32>
    %218 = arith.negf %217 : vector<2x32xf32>
    %219 = math.exp %218 : vector<2x32xf32>
    %cst_40 = arith.constant 1.000000e+00 : f32
    %220 = vector.broadcast %cst_40 : f32 to vector<2x32xf32>
    %221 = arith.addf %220, %219 : vector<2x32xf32>
    %222 = arith.divf %220, %221 : vector<2x32xf32>
    %223 = vector.extract_strided_slice %206 {offsets = [0, 64], sizes = [2, 32], strides = [1, 1]} : vector<2x96xf32> to vector<2x32xf32>
    %224 = vector.extract_strided_slice %204 {offsets = [0, 64], sizes = [2, 32], strides = [1, 1]} : vector<2x96xf32> to vector<2x32xf32>
    %225 = arith.mulf %214, %224 : vector<2x32xf32>
    %226 = arith.addf %223, %225 : vector<2x32xf32>
    %227 = math.tanh %226 : vector<2x32xf32>
    %cst_41 = arith.constant 1.000000e+00 : f32
    %228 = vector.broadcast %cst_41 : f32 to vector<2x32xf32>
    %229 = arith.subf %228, %222 : vector<2x32xf32>
    %230 = arith.mulf %229, %227 : vector<2x32xf32>
    %231 = arith.mulf %222, %201 : vector<2x32xf32>
    %232 = arith.addf %230, %231 : vector<2x32xf32>
    %cst_42 = arith.constant dense<0.000000e+00> : vector<2x96xf32>
    %233 = tpu.matmul %232, %13, %cst_42 {dimension_numbers = #tpu.dot_dimension_numbers<[1], [0], [0], [1], [0, 0, 1, 1], [], []>} : vector<2x32xf32>, vector<32x96xf32>, vector<2x96xf32> -> vector<2x96xf32>
    %234 = vector.broadcast %14 : vector<1x96xf32> to vector<2x96xf32>
    %235 = arith.addf %233, %234 : vector<2x96xf32>
    %236 = vector.extract_strided_slice %12 {offsets = [0, 7, 0], sizes = [2, 1, 96], strides = [1, 1, 1]} : vector<2x8x96xf32> to vector<2x1x96xf32>
    %237 = vector.shape_cast %236 : vector<2x1x96xf32> to vector<2x96xf32>
    %238 = vector.extract_strided_slice %237 {offsets = [0, 0], sizes = [2, 32], strides = [1, 1]} : vector<2x96xf32> to vector<2x32xf32>
    %239 = vector.extract_strided_slice %235 {offsets = [0, 0], sizes = [2, 32], strides = [1, 1]} : vector<2x96xf32> to vector<2x32xf32>
    %240 = arith.addf %238, %239 : vector<2x32xf32>
    %241 = arith.negf %240 : vector<2x32xf32>
    %242 = math.exp %241 : vector<2x32xf32>
    %cst_43 = arith.constant 1.000000e+00 : f32
    %243 = vector.broadcast %cst_43 : f32 to vector<2x32xf32>
    %244 = arith.addf %243, %242 : vector<2x32xf32>
    %245 = arith.divf %243, %244 : vector<2x32xf32>
    %246 = vector.extract_strided_slice %237 {offsets = [0, 32], sizes = [2, 32], strides = [1, 1]} : vector<2x96xf32> to vector<2x32xf32>
    %247 = vector.extract_strided_slice %235 {offsets = [0, 32], sizes = [2, 32], strides = [1, 1]} : vector<2x96xf32> to vector<2x32xf32>
    %248 = arith.addf %246, %247 : vector<2x32xf32>
    %249 = arith.negf %248 : vector<2x32xf32>
    %250 = math.exp %249 : vector<2x32xf32>
    %cst_44 = arith.constant 1.000000e+00 : f32
    %251 = vector.broadcast %cst_44 : f32 to vector<2x32xf32>
    %252 = arith.addf %251, %250 : vector<2x32xf32>
    %253 = arith.divf %251, %252 : vector<2x32xf32>
    %254 = vector.extract_strided_slice %237 {offsets = [0, 64], sizes = [2, 32], strides = [1, 1]} : vector<2x96xf32> to vector<2x32xf32>
    %255 = vector.extract_strided_slice %235 {offsets = [0, 64], sizes = [2, 32], strides = [1, 1]} : vector<2x96xf32> to vector<2x32xf32>
    %256 = arith.mulf %245, %255 : vector<2x32xf32>
    %257 = arith.addf %254, %256 : vector<2x32xf32>
    %258 = math.tanh %257 : vector<2x32xf32>
    %cst_45 = arith.constant 1.000000e+00 : f32
    %259 = vector.broadcast %cst_45 : f32 to vector<2x32xf32>
    %260 = arith.subf %259, %253 : vector<2x32xf32>
    %261 = arith.mulf %260, %258 : vector<2x32xf32>
    %262 = arith.mulf %253, %232 : vector<2x32xf32>
    %263 = arith.addf %261, %262 : vector<2x32xf32>
    %264 = vector.shape_cast %46 : vector<2x32xf32> to vector<2x1x32xf32>
    %265 = vector.shape_cast %77 : vector<2x32xf32> to vector<2x1x32xf32>
    %266 = vector.shape_cast %108 : vector<2x32xf32> to vector<2x1x32xf32>
    %267 = vector.shape_cast %139 : vector<2x32xf32> to vector<2x1x32xf32>
    %268 = vector.shape_cast %170 : vector<2x32xf32> to vector<2x1x32xf32>
    %269 = vector.shape_cast %201 : vector<2x32xf32> to vector<2x1x32xf32>
    %270 = vector.shape_cast %232 : vector<2x32xf32> to vector<2x1x32xf32>
    %271 = vector.shape_cast %263 : vector<2x32xf32> to vector<2x1x32xf32>
    %272 = tpu.concatenate %264, %265, %266, %267, %268, %269, %270, %271 in 1 : vector<2x1x32xf32>, vector<2x1x32xf32>, vector<2x1x32xf32>, vector<2x1x32xf32>, vector<2x1x32xf32>, vector<2x1x32xf32>, vector<2x1x32xf32>, vector<2x1x32xf32> -> vector<2x8x32xf32>
    %c0_46 = arith.constant 0 : index
    %c0_47 = arith.constant 0 : index
    %c0_48 = arith.constant 0 : index
    %273 = vector.load %arg8[%c0_46, %c0_47, %c0_48] : memref<2x8x32xf32, #tpu.memory_space<vmem>>, vector<2x8x32xf32>
    tpu.vector_store %arg8[%c0_46, %c0_47, %c0_48], %272 {strides = array<i32>} : memref<2x8x32xf32, #tpu.memory_space<vmem>>, vector<2x8x32xf32>,
    %c0_49 = arith.constant 0 : index
    %c0_50 = arith.constant 0 : index
    %274 = vector.load %arg9[%c0_49, %c0_50] : memref<2x32xf32, #tpu.memory_space<vmem>>, vector<2x32xf32>
    tpu.vector_store %arg9[%c0_49, %c0_50], %263 {strides = array<i32>} : memref<2x32xf32, #tpu.memory_space<vmem>>, vector<2x32xf32>,
    return
  }
  func.func @transform_0(%arg0: i32, %arg1: i32) -> (i32, i32, i32) {
    %c0_i32 = arith.constant 0 : i32
    %c0_i32_0 = arith.constant 0 : i32
    return %arg0, %arg1, %c0_i32 : i32, i32, i32
  }
  func.func @transform_1(%arg0: i32, %arg1: i32) -> (i32, i32, i32) {
    %c0_i32 = arith.constant 0 : i32
    %c0_i32_0 = arith.constant 0 : i32
    %c0_i32_1 = arith.constant 0 : i32
    return %arg0, %c0_i32, %c0_i32_0 : i32, i32, i32
  }
  func.func @transform_2(%arg0: i32, %arg1: i32) -> (i32, i32) {
    %c0_i32 = arith.constant 0 : i32
    %c0_i32_0 = arith.constant 0 : i32
    %c0_i32_1 = arith.constant 0 : i32
    return %c0_i32, %c0_i32_0 : i32, i32
  }
  func.func @transform_3(%arg0: i32, %arg1: i32) -> (i32, i32) {
    %c0_i32 = arith.constant 0 : i32
    %c0_i32_0 = arith.constant 0 : i32
    %c0_i32_1 = arith.constant 0 : i32
    return %c0_i32, %c0_i32_0 : i32, i32
  }
  func.func @transform_4(%arg0: i32, %arg1: i32) -> (i32, i32) {
    %c0_i32 = arith.constant 0 : i32
    %c0_i32_0 = arith.constant 0 : i32
    %c0_i32_1 = arith.constant 0 : i32
    return %c0_i32, %c0_i32_0 : i32, i32
  }
  func.func @transform_5(%arg0: i32, %arg1: i32) -> (i32, i32) {
    %c0_i32 = arith.constant 0 : i32
    %c0_i32_0 = arith.constant 0 : i32
    %c0_i32_1 = arith.constant 0 : i32
    return %c0_i32, %c0_i32_0 : i32, i32
  }
  func.func @transform_6(%arg0: i32, %arg1: i32) -> (i32, i32, i32) {
    %c0_i32 = arith.constant 0 : i32
    %c0_i32_0 = arith.constant 0 : i32
    return %arg0, %arg1, %c0_i32 : i32, i32, i32
  }
}

</mosaic_0001>

<bundles_post_ra>
// kernel: _encode_forward_impl.1
= control target key start
LH: loop header
LB: loop body
LE: loop exit
PB: predicated region body
PF: predicated region fallthrough
CT: control target
= control target key end

     0   :  { %11 = vsyncpa [#allocation4], 0  ;;  %s2078_s0 = inlined_call_operand.hbm [shape: f32[2,8,32], index: 0, kind: input, shape index: {}]   ;;  %s2079_s1 = inlined_call_operand.vmem [shape: f32[2,1,32], index: 1, kind: input, shape index: {}]   ;;  %s2080_s2 = inlined_call_operand.hbm [shape: f32[32,96], index: 2, kind: input, shape index: {}]   ;;  %s2081_s3 = inlined_call_operand.hbm [shape: f32[32,96], index: 3, kind: input, shape index: {}]   ;;  %s2082_s4 = inlined_call_operand.vmem [shape: f32[1,96], index: 4, kind: input, shape index: {}]   ;;  %s2083_s5 = inlined_call_operand.vmem [shape: f32[1,96], index: 5, kind: input, shape index: {}]   ;;  %s2084_s6 = inlined_call_operand.vmem [shape: f32[2,8,32], index: 6, kind: output, shape index: {}]  }
   0x1   :  { %12 = vsyncpa [#allocation6], 0  ;;  %s1753_s21 = smov [#allocation5]   ;;  %s1754_s23 = smov [#allocation3]  }
   0x2   :  { %s32_s22 = sshll.u32 %s1753_s21, 4  ;;  %s18_s24 = sshll.u32 %s1754_s23, 4  ;;  %s33_s22 = int_to_ptr.vmem [resolvable:$true] %s32_s22  ;;  %s1800_s24 = int_to_ptr.vmem [resolvable:$true] %s18_s24 }
   0x3   :  { %s1683_s27 = scalar_lea.hbm %s2080_s2, 512 }
   0x4   :  { %p1684_p0 = scmp.ne.s32.totalorder %s2080_s2, %s1683_s27  ;;  %p1687_p1 = scmp.lt.u32.totalorder %s1683_s27, %s2080_s2 }
   0x6   :  { %p1689_p2 = pnand %p1687_p1, %p1684_p0 }
   0x8   :  { %1692 = shalt.err (!%p1689_p2)
}
   0x9   :  { %s1693_s8 = scalar_lea.vmem %s33_s22, 512  ;;  %p1698_p4 = scmp.lt.s32.totalorder %s33_s22, %s33_s22 }
   0xa   :  { %p1694_p3 = scmp.ne.s32.totalorder %s33_s22, %s1693_s8  ;;  %p1699_p5 = scmp.lt.s32.totalorder %s1693_s8, %s1693_s8 }
   0xc   :  { %p1700_p6 = por %p1699_p5, %p1698_p4 }
   0xe   :  { %p1701_p7 = pnand %p1700_p6, %p1694_p3 }
  0x10   :  { %1704 = shalt.err (!%p1701_p7)
}
  0x11   :  { %s1755_s9 = smov 128   ;;  %s1756_s10 = smov 8  }
  0x12   :  { %38 = dma.hbm_to_vmem [thread:$0]  %s2080_s2, 512, %s33_s22, [#allocation6], %s1755_s9, %s1755_s9, %s1756_s10  }
  0x13   :  { %s1705_s15 = scalar_lea.hbm %s2078_s0, 256 }
  0x14   :  { %p1706_p8 = scmp.ne.s32.totalorder %s2078_s0, %s1705_s15  ;;  %p1709_p9 = scmp.lt.u32.totalorder %s1705_s15, %s2078_s0 }
  0x16   :  { %p1711_p10 = pnand %p1709_p9, %p1706_p8 }
  0x18   :  { %1714 = shalt.err (!%p1711_p10)
}
  0x19   :  { %s1715_s20 = scalar_lea.vmem %s1800_s24, 256  ;;  %p1720_p12 = scmp.lt.s32.totalorder %s1800_s24, %s1800_s24 }
  0x1a   :  { %p1716_p11 = scmp.ne.s32.totalorder %s1800_s24, %s1715_s20  ;;  %p1721_p13 = scmp.lt.s32.totalorder %s1715_s20, %s1715_s20 }
  0x1c   :  { %p1722_p0 = por %p1721_p13, %p1720_p12 }
  0x1e   :  { %p1723_p1 = pnand %p1722_p0, %p1716_p11 }
  0x20   :  { %1726 = shalt.err (!%p1723_p1)
}
  0x21   :  { %24 = dma.hbm_to_vmem [thread:$0]  %s2078_s0, 256, %s1800_s24, [#allocation4], %s1755_s9, %s1755_s9, %s1756_s10  }
  0x22   :  { %s1757_s22 = smov [#allocation7]   ;;  %s1727_s27 = scalar_lea.hbm %s2081_s3, 512 }
  0x23   :  { %s44_s23 = sshll.u32 %s1757_s22, 4  ;;  %p1728_p2 = scmp.ne.s32.totalorder %s2081_s3, %s1727_s27  ;;  %s45_s23 = int_to_ptr.vmem [resolvable:$true] %s44_s23 }
  0x24   :  { %p1731_p3 = scmp.lt.u32.totalorder %s1727_s27, %s2081_s3 }
  0x26   :  { %p1733_p4 = pnand %p1731_p3, %p1728_p2 }
  0x28   :  { %1736 = shalt.err (!%p1733_p4)
}
  0x29   :  { %s1737_s8 = scalar_lea.vmem %s45_s23, 512  ;;  %p1742_p6 = scmp.lt.s32.totalorder %s45_s23, %s45_s23 }
  0x2a   :  { %p1738_p5 = scmp.ne.s32.totalorder %s45_s23, %s1737_s8  ;;  %p1743_p7 = scmp.lt.s32.totalorder %s1737_s8, %s1737_s8 }
  0x2c   :  { %p1744_p8 = por %p1743_p7, %p1742_p6 }
  0x2e   :  { %p1745_p9 = pnand %p1744_p8, %p1738_p5 }
  0x30   :  { %1748 = shalt.err (!%p1745_p9)
}
  0x31   :  { %50 = dma.hbm_to_vmem [thread:$0]  %s2081_s3, 512, %s45_s23, [#allocation6], %s1755_s9, %s1755_s9, %s1756_s10  }
  0x32   :  { %1749 = dma.done.wait [#allocation4], 256  }
  0x33   :  { %1750 = vsyncadd [#allocation4], 4294967040 }
  0x34   :  { %1751 = dma.done.wait [#allocation6], 1024  }
  0x35   :  { %1752 = vsyncadd [#allocation6], 4294966272  ;;  %v1758_v0 = vmov 0.0|0.0   ;;  %vm1759_vm0 = vmmov 0   ;;  %v1760_v1 = vmov 0.0   ;;  %v76_v2 = vlaneseq  ;;  %v94_v7 = vld [vmem:[#allocation5] sm:$0xff] }
  0x36   :  { %1527 = vmatprep.subr.bf16.mxu1 %v1758_v0  ;;  %1439 = vmatprep.mubr.msk.f32.mxu1 %vm1759_vm0, %v1760_v1  ;;  %v1761_v3 = vmov 1966171168   ;;  %v95_v8 = vld [vmem:[#allocation5 + $0x8] sm:$0xff]  ;;  %v187_v9 = vld [vmem:[#allocation7] sm:$0xff]  ;;  %v96_v12 = vld [vmem:[#allocation5 + $0x10] sm:$0xff]  ;;  %vm105_vm1 = vcmask 261120  }
  0x37   :  { %v74_v4 = vunpack.c.l.s4 %v1761_v3  ;;  %v77_v6 = vshrl.u32 %v76_v2, 7  ;;  %v1519_v10 = vpack.c.bf16 %v95_v8, %v94_v7  ;;  %v188_v11 = vld [vmem:[#allocation7 + $0x8] sm:$0xff]  ;;  %v97_v13 = vld [vmem:[#allocation5 + $0x18] sm:$0xff]  ;;  %v189_v16 = vld [vmem:[#allocation7 + $0x10] sm:$0xff]  ;;  %vm88_vm2 = vcmask 254976   ;;  %s1762_s13 = smov 64  }
  0x38   :  { %v1855_v14 = vpack.c.bf16 %v188_v11, %v187_v9  ;;  %v1523_v15 = vpack.c.bf16 %v97_v13, %v96_v12  ;;  %v190_v17 = vld [vmem:[#allocation7 + $0x18] sm:$0xff]  ;;  %v90_v18 = vld [vmem:[#allocation3] sm:$0xff]  ;;  %v68_v21 = vld [vmem:[%s2079_s1] sm:$0x1]  ;;  %vm336_vm3 = vcmask 1041409   ;;  %vm1296_vm4 = vcmask 1040384  }
  0x39   :  { %v75_v5 = vunpack.c.0.s8 %v74_v4  ;;  %1520 = vmatprep.subr.bf16.mxu0 %v1519_v10  ;;  %v92_v20 = vmax.f32 %v90_v18, 0.0  ;;  %v69_v22 = vld [vmem:[%s2079_s1 + $0x1] sm:$0x1]  ;;  %v1864_v23 = vpack.c.bf16 %v190_v17, %v189_v16  ;;  %v91_v24 = vld [vmem:[#allocation3 + $0x8] sm:$0xff]  ;;  %v1888_v32 = vld [vmem:[%s2083_s5] ss:$0 sm:$0xff] }
  0x3a   :  { %1522 = vmatpush3.bf16.msra.mxu0 %v1519_v10  ;;  %1529 = vmatpush3.bf16.msra.mxu1 %v1855_v14  ;;  %v72_v25 = vcombine.low %v68_v21, %v69_v22  ;;  %v93_v27 = vmax.f32 %v91_v24, 0.0  ;;  %v1346_v37 = vld [vmem:[%s2082_s4] ss:$0 sm:$0xff]  ;;  %s1763_s4 = smov 32   ;;  %s1764_s5 = smov 96   ;;  %vm1299_vm5 = vcmask 1041408  }
  0x3b   :  { %v78_v19 = vsub.s32 %v75_v5, %v77_v6  ;;  %1524 = vmatprep.subr.bf16.mxu0 %v1523_v15  ;;  %1530 = vmatprep.subr.bf16.mxu1 %v1758_v0  ;;  %vm1302_vm6 = vcmask 1042432   ;;  %vm1305_vm7 = vcmask 1043456   ;;  %vm1308_vm8 = vcmask 1044480  }
  0x3c   :  { %1428 = vmatprep.mubr.msk.f32.mxu0 %vm105_vm1, %v92_v20  ;;  %vm1311_vm9 = vcmask 1045504   ;;  %vm1314_vm10 = vcmask 1046528   ;;  %vm1338_vm11 = vcmask 253952   ;;  %vm1336_vm12 = vcmask 261127  }
  0x3d   :  { %v79_v26 = vrot.slane %v72_v25, %v78_v19 }
  0x3e   :  { %1526 = vmatpush3.bf16.msra.mxu0 %v1523_v15  ;;  %1532 = vmatpush3.bf16.msra.mxu1 %v1864_v23 }
  0x3f   :  { %v86_v28 = vrot.slane %v79_v26, %v78_v19  ;;  %1533 = vmatprep.subr.bf16.mxu0 %v1758_v0  ;;  %1539 = vmatprep.subr.bf16.mxu1 %v1758_v0 }
  0x41   :  { %89 = vst.msk [vmem:[#allocation2] sm:$0x3] %vm88_vm2, %v86_v28  ;;  %1429 = vmatmul.mubr.msk.f32.vlgmr.msra.gmra.mrb[0].mxu0 %vm105_vm1, %v93_v27 }
  0x42   :  { %1535 = vmatpush3.bf16.msra.mxu0 %v1855_v14  ;;  %1450 = vmatprep.mubr.msk.f32.mxu0 %vm1759_vm0, %v1760_v1 }
  0x43   :  { %1536 = vmatprep.subr.bf16.mxu0 %v1758_v0 }
  0x46   :  { %1538 = vmatpush3.bf16.msra.mxu0 %v1864_v23 }
  0x47   :  { %1545 = vmatprep.subr.bf16.mxu0 %v1758_v0 }
  0x48   :  { %v192_v29 = vld [vmem:[#allocation2] sm:$0x3] }
  0x49   :  { %1440 = vmatmul.mubr.msk.f32.vlgmr.msra.gmra.mrb[0].mxu1 %vm105_vm1, %v192_v29  ;;  %v322_v54 = vrot.slane %v192_v29, 1 }
  0x4a   :  { %1541 = vmatpush3.bf16.msra.mxu1 %v1855_v14  ;;  %1461 = vmatprep.mubr.msk.f32.mxu1 %vm1759_vm0, %v1760_v1 }
  0x4b   :  { %1542 = vmatprep.subr.bf16.mxu1 %v1758_v0 }
  0x4e   :  { %1544 = vmatpush3.bf16.msra.mxu1 %v1864_v23 }
  0x4f   :  { %1551 = vmatprep.subr.bf16.mxu1 %v1758_v0 }
 0x114   :  { %v1430_v30 = vpop.f32.mrb[0].mxu0 }
 0x115   :  { %v178_v31 = vpop.f32.mrb[1].mxu0  ;;  %v1896_v38 = vadd.f32 %v1430_v30, %v1346_v37 }
 0x116   :  { %v1898_v39 = vadd.f32 %v1346_v37, %v178_v31 }
 0x11c   :  { %v268_v33 = vpop.f32.mrb[0].mxu1 }
 0x11d   :  { %v269_v34 = vadd.f32 %v1888_v32, %v268_v33  ;;  %v1441_v35 = vpop.f32.mrb[1].mxu1 }
 0x11f   :  { %v273_v36 = vrot.slane %v269_v34, 1  ;;  %v276_v41 = vadd.f32 %v269_v34, %v1898_v39 }
 0x121   :  { %292 = vrot.lane.b32.xlu0 %v273_v36, %s1762_s13  ;;  %v277_v40 = vadd.f32 %v273_v36, %v1896_v38  ;;  %v1351_v43 = vmul.f32 -1.442695, %v276_v41 }
 0x123   :  { %v1352_v42 = vmul.f32 -1.442695, %v277_v40 }
 0x125   :  { %290 = vrot.lane.b32.xlu0 %v269_v34, %s1762_s13  ;;  %1587 = vpow2.f32 %v1352_v42 }
 0x126   :  { %1589 = vpow2.f32 %v1351_v43 }
 0x12f   :  { %v1588_v44 = vpop.eup %1587 }
 0x130   :  { %v285_v45 = vadd.f32 1.0, %v1588_v44  ;;  %v1590_v46 = vpop.eup %1589 }
 0x131   :  { %v284_v47 = vadd.f32 1.0, %v1590_v46 }
 0x132   :  { %1591 = vrcp.f32 %v285_v45 }
 0x133   :  { %1593 = vrcp.f32 %v284_v47 }
 0x13c   :  { %v1592_v48 = vpop.eup %1591 }
 0x13d   :  { %v1594_v51 = vpop.eup %1593  ;;  %v311_v62 = vsub.f32 1.0, %v1592_v48 }
 0x13e   :  { %v310_v6 = vsub.f32 1.0, %v1594_v51 }
 0x193   :  { %v293_v49 = vpop.permute.xlu0 %292 }
 0x194   :  { %v297_v50 = vmul.f32 %v1592_v48, %v293_v49 }
 0x196   :  { %302 = vrot.lane.b32.xlu1 %v297_v50, %s1762_s13 }
 0x197   :  { %v291_v52 = vpop.permute.xlu0 %290 }
 0x198   :  { %v296_v53 = vmul.f32 %v1594_v51, %v291_v52 }
 0x19a   :  { %300 = vrot.lane.b32.xlu1 %v296_v53, %s1762_s13 }
 0x19e   :  { %325 = vrot.lane.b32.xlu1 %v322_v54, %s1763_s4 }
 0x1a2   :  { %323 = vrot.lane.b32.xlu1 %v192_v29, %s1763_s4 }
 0x208   :  { %v303_v55 = vpop.permute.xlu1 %302 }
 0x209   :  { %v307_v56 = vadd.f32 %v303_v55, %v1896_v38 }
 0x20b   :  { %1595 = vtanh.f32 %v307_v56 }
 0x20c   :  { %v301_v57 = vpop.permute.xlu1 %300 }
 0x20d   :  { %v306_v58 = vadd.f32 %v301_v57, %v1898_v39 }
 0x20f   :  { %1597 = vtanh.f32 %v306_v58 }
 0x210   :  { %v326_v61 = vpop.permute.xlu1 %325 }
 0x211   :  { %v330_v2 = vmul.f32 %v1592_v48, %v326_v61 }
 0x214   :  { %v324_v4 = vpop.permute.xlu1 %323 }
 0x215   :  { %v1596_v59 = vpop.eup %1595  ;;  %v329_v8 = vmul.f32 %v1594_v51, %v324_v4 }
 0x216   :  { %316 = vrot.lane.b32.xlu0 %v1596_v59, %s1764_s5 }
 0x219   :  { %v1598_v60 = vpop.eup %1597 }
 0x21a   :  { %314 = vrot.lane.b32.xlu0 %v1598_v60, %s1764_s5 }
 0x288   :  { %v317_v63 = vpop.permute.xlu0 %316 }
 0x289   :  { %v321_v3 = vmul.f32 %v317_v63, %v311_v62 }
 0x28b   :  { %v1908_v5 = vadd.f32 %v330_v2, %v321_v3 }
 0x28c   :  { %v315_v7 = vpop.permute.xlu0 %314 }
 0x28d   :  { %v320_v9 = vmul.f32 %v315_v7, %v310_v6  ;;  %v335_v10 = vrot.slane %v1908_v5, 7 }
 0x28f   :  { %v1911_v11 = vadd.f32 %v329_v8, %v320_v9 }
 0x291   :  { %v337_v12 = vsel %vm336_vm3, %v335_v10, %v1911_v11  ;;  %v462_v46 = vrot.slane %v1911_v11, 7 }
 0x292   :  { %338 = vrot.lane.b32.xlu0 %v337_v12, %s1764_s5 }
 0x304   :  { %v339_v13 = vpop.permute.xlu0 %338 }
 0x305   :  { %1451 = vmatmul.mubr.msk.f32.vlgmr.msra.gmra.mrb[2].mxu0 %vm105_vm1, %v339_v13 }
 0x306   :  { %1547 = vmatpush3.bf16.msra.mxu0 %v1855_v14  ;;  %1472 = vmatprep.mubr.msk.f32.mxu0 %vm1759_vm0, %v1760_v1 }
 0x307   :  { %1548 = vmatprep.subr.bf16.mxu0 %v1758_v0 }
 0x30a   :  { %1550 = vmatpush3.bf16.msra.mxu0 %v1864_v23 }
 0x30b   :  { %1557 = vmatprep.subr.bf16.mxu0 %v1758_v0 }
 0x3d8   :  { %v408_v15 = vpop.f32.mrb[2].mxu0 }
 0x3d9   :  { %v409_v16 = vadd.f32 %v1888_v32, %v408_v15  ;;  %v1452_v17 = vpop.f32.mrb[3].mxu0 }
 0x3db   :  { %432 = vrot.lane.b32.xlu0 %v409_v16, %s1762_s13  ;;  %v413_v18 = vrot.slane %v409_v16, 7  ;;  %v417_v19 = vadd.f32 %v409_v16, %v1896_v38 }
 0x3dd   :  { %430 = vrot.lane.b32.xlu1 %v413_v18, %s1762_s13  ;;  %v416_v20 = vadd.f32 %v413_v18, %v1898_v39  ;;  %v1355_v21 = vmul.f32 -1.442695, %v417_v19 }
 0x3df   :  { %v1354_v22 = vmul.f32 -1.442695, %v416_v20  ;;  %1599 = vpow2.f32 %v1355_v21 }
 0x3e1   :  { %1601 = vpow2.f32 %v1354_v22 }
 0x3e9   :  { %v1600_v24 = vpop.eup %1599 }
 0x3ea   :  { %v425_v26 = vadd.f32 1.0, %v1600_v24 }
 0x3eb   :  { %v1602_v25 = vpop.eup %1601 }
 0x3ec   :  { %v424_v27 = vadd.f32 1.0, %v1602_v25  ;;  %1603 = vrcp.f32 %v425_v26 }
 0x3ee   :  { %1605 = vrcp.f32 %v424_v27 }
 0x3f6   :  { %v1604_v28 = vpop.eup %1603 }
 0x3f7   :  { %v451_v44 = vsub.f32 1.0, %v1604_v28  ;;  %v466_v51 = vmul.f32 %v1604_v28, %v335_v10 }
 0x3f8   :  { %v1606_v31 = vpop.eup %1605 }
 0x3f9   :  { %v450_v45 = vsub.f32 1.0, %v1606_v31  ;;  %v465_v49 = vmul.f32 %v1606_v31, %v462_v46 }
 0x44d   :  { %v433_v29 = vpop.permute.xlu0 %432 }
 0x44e   :  { %v437_v30 = vmul.f32 %v1604_v28, %v433_v29 }
 0x44f   :  { %v431_v33 = vpop.permute.xlu1 %430 }
 0x450   :  { %v436_v34 = vmul.f32 %v1606_v31, %v431_v33  ;;  %442 = vrot.lane.b32.xlu0 %v437_v30, %s1762_s13 }
 0x452   :  { %440 = vrot.lane.b32.xlu1 %v436_v34, %s1762_s13 }
 0x4c2   :  { %v443_v35 = vpop.permute.xlu0 %442 }
 0x4c3   :  { %v447_v36 = vadd.f32 %v443_v35, %v1896_v38 }
 0x4c4   :  { %v441_v37 = vpop.permute.xlu1 %440 }
 0x4c5   :  { %1607 = vtanh.f32 %v447_v36  ;;  %v446_v40 = vadd.f32 %v441_v37, %v1898_v39 }
 0x4c7   :  { %1609 = vtanh.f32 %v446_v40 }
 0x4cf   :  { %v1608_v41 = vpop.eup %1607 }
 0x4d0   :  { %456 = vrot.lane.b32.xlu0 %v1608_v41, %s1764_s5 }
 0x4d1   :  { %v1610_v42 = vpop.eup %1609 }
 0x4d2   :  { %454 = vrot.lane.b32.xlu1 %v1610_v42, %s1764_s5 }
 0x542   :  { %v457_v43 = vpop.permute.xlu0 %456 }
 0x543   :  { %v461_v48 = vmul.f32 %v457_v43, %v451_v44 }
 0x544   :  { %v455_v47 = vpop.permute.xlu1 %454 }
 0x545   :  { %v460_v50 = vmul.f32 %v455_v47, %v450_v45  ;;  %v468_v53 = vadd.f32 %v466_v51, %v461_v48 }
 0x547   :  { %v1935_v52 = vadd.f32 %v465_v49, %v460_v50  ;;  %v599_v25 = vrot.slane %v468_v53, 7  ;;  %v1298_v36 = vsel %vm1296_vm4, %v1908_v5, %v468_v53 }
 0x549   :  { %v471_v54 = vrot.slane %v1935_v52, 1  ;;  %v598_v28 = vrot.slane %v1935_v52, 7  ;;  %v1297_v40 = vsel %vm1296_vm4, %v1911_v11, %v1935_v52 }
 0x54b   :  { %v472_v55 = vsel %vm336_vm3, %v468_v53, %v471_v54 }
 0x54c   :  { %473 = vrot.lane.b32.xlu1 %v472_v55, %s1764_s5 }
 0x5be   :  { %v474_v56 = vpop.permute.xlu1 %473 }
 0x5bf   :  { %1462 = vmatmul.mubr.msk.f32.vlgmr.msra.gmra.mrb[2].mxu1 %vm105_vm1, %v474_v56 }
 0x5c0   :  { %1553 = vmatpush3.bf16.msra.mxu1 %v1855_v14  ;;  %1483 = vmatprep.mubr.msk.f32.mxu1 %vm1759_vm0, %v1760_v1 }
 0x5c1   :  { %1554 = vmatprep.subr.bf16.mxu1 %v1758_v0 }
 0x5c4   :  { %1556 = vmatpush3.bf16.msra.mxu1 %v1864_v23 }
 0x5c5   :  { %1563 = vmatprep.subr.bf16.mxu1 %v1758_v0 }
 0x692   :  { %v543_v57 = vpop.f32.mrb[2].mxu1 }
 0x693   :  { %v544_v58 = vadd.f32 %v1888_v32, %v543_v57  ;;  %v1463_v59 = vpop.f32.mrb[3].mxu1 }
 0x695   :  { %v548_v60 = vrot.slane %v544_v58, 6  ;;  %v549_v61 = vrot.slane %v544_v58, 7 }
 0x697   :  { %568 = vrot.lane.b32.xlu1 %v549_v61, %s1762_s13  ;;  %566 = vrot.lane.b32.xlu0 %v548_v60, %s1762_s13  ;;  %v552_v62 = vadd.f32 %v548_v60, %v1898_v39  ;;  %v553_v63 = vadd.f32 %v549_v61, %v1896_v38 }
 0x699   :  { %v1357_v2 = vmul.f32 -1.442695, %v552_v62  ;;  %v1358_v3 = vmul.f32 -1.442695, %v553_v63 }
 0x69b   :  { %1611 = vpow2.f32 %v1357_v2 }
 0x69c   :  { %1613 = vpow2.f32 %v1358_v3 }
 0x6a5   :  { %v1612_v4 = vpop.eup %1611 }
 0x6a6   :  { %v1614_v6 = vpop.eup %1613  ;;  %v560_v7 = vadd.f32 1.0, %v1612_v4 }
 0x6a7   :  { %v561_v8 = vadd.f32 1.0, %v1614_v6 }
 0x6a8   :  { %1615 = vrcp.f32 %v560_v7 }
 0x6a9   :  { %1617 = vrcp.f32 %v561_v8 }
 0x6b2   :  { %v1616_v9 = vpop.eup %1615 }
 0x6b3   :  { %v1618_v10 = vpop.eup %1617  ;;  %v586_v27 = vsub.f32 1.0, %v1616_v9  ;;  %v602_v33 = vmul.f32 %v1616_v9, %v598_v28 }
 0x6b4   :  { %v587_v24 = vsub.f32 1.0, %v1618_v10  ;;  %v603_v29 = vmul.f32 %v1618_v10, %v599_v25 }
 0x709   :  { %v569_v12 = vpop.permute.xlu1 %568  ;;  %v567_v13 = vpop.permute.xlu0 %566 }
 0x70a   :  { %v573_v15 = vmul.f32 %v1618_v10, %v569_v12  ;;  %v572_v16 = vmul.f32 %v1616_v9, %v567_v13 }
 0x70c   :  { %578 = vrot.lane.b32.xlu1 %v573_v15, %s1762_s13  ;;  %576 = vrot.lane.b32.xlu0 %v572_v16, %s1762_s13 }
 0x77e   :  { %v579_v17 = vpop.permute.xlu1 %578  ;;  %v577_v18 = vpop.permute.xlu0 %576 }
 0x77f   :  { %v583_v19 = vadd.f32 %v579_v17, %v1896_v38  ;;  %v582_v20 = vadd.f32 %v577_v18, %v1898_v39 }
 0x781   :  { %1619 = vtanh.f32 %v583_v19 }
 0x782   :  { %1621 = vtanh.f32 %v582_v20 }
 0x78b   :  { %v1620_v21 = vpop.eup %1619 }
 0x78c   :  { %v1622_v22 = vpop.eup %1621  ;;  %592 = vrot.lane.b32.xlu1 %v1620_v21, %s1764_s5 }
 0x78d   :  { %590 = vrot.lane.b32.xlu0 %v1622_v22, %s1764_s5 }
 0x7fe   :  { %v593_v26 = vpop.permute.xlu1 %592 }
 0x7ff   :  { %v597_v30 = vmul.f32 %v593_v26, %v587_v24  ;;  %v591_v31 = vpop.permute.xlu0 %590 }
 0x800   :  { %v596_v34 = vmul.f32 %v591_v31, %v586_v27 }
 0x801   :  { %v605_v35 = vadd.f32 %v603_v29, %v597_v30 }
 0x802   :  { %v604_v37 = vadd.f32 %v602_v33, %v596_v34 }
 0x803   :  { %v1962_v41 = vsel %vm1299_vm5, %v1298_v36, %v605_v35  ;;  %v609_v42 = vrot.slane %v605_v35, 1  ;;  %v737_v10 = vrot.slane %v605_v35, 7 }
 0x804   :  { %v1964_v43 = vsel %vm1299_vm5, %v1297_v40, %v604_v37  ;;  %v608_v44 = vrot.slane %v604_v37, 2  ;;  %v736_v15 = vrot.slane %v604_v37, 7 }
 0x806   :  { %v610_v45 = vsel %vm336_vm3, %v609_v42, %v608_v44 }
 0x807   :  { %611 = vrot.lane.b32.xlu0 %v610_v45, %s1764_s5 }
 0x879   :  { %v612_v46 = vpop.permute.xlu0 %611 }
 0x87a   :  { %1473 = vmatmul.mubr.msk.f32.vlgmr.msra.gmra.mrb[4].mxu0 %vm105_vm1, %v612_v46 }
 0x87b   :  { %1559 = vmatpush3.bf16.msra.mxu0 %v1855_v14  ;;  %1494 = vmatprep.mubr.msk.f32.mxu0 %vm1759_vm0, %v1760_v1 }
 0x87c   :  { %1560 = vmatprep.subr.bf16.mxu0 %v1758_v0 }
 0x87f   :  { %1562 = vmatpush3.bf16.msra.mxu0 %v1864_v23 }
 0x880   :  { %1569 = vmatprep.subr.bf16.mxu0 %v1758_v0 }
 0x94d   :  { %v681_v5 = vpop.f32.mrb[4].mxu0 }
 0x94e   :  { %v682_v11 = vadd.f32 %v1888_v32, %v681_v5  ;;  %v1474_v47 = vpop.f32.mrb[5].mxu0 }
 0x950   :  { %v686_v48 = vrot.slane %v682_v11, 5  ;;  %v687_v49 = vrot.slane %v682_v11, 6 }
 0x952   :  { %706 = vrot.lane.b32.xlu0 %v687_v49, %s1762_s13  ;;  %704 = vrot.lane.b32.xlu1 %v686_v48, %s1762_s13  ;;  %v690_v50 = vadd.f32 %v686_v48, %v1898_v39  ;;  %v691_v51 = vadd.f32 %v687_v49, %v1896_v38 }
 0x954   :  { %v1360_v52 = vmul.f32 -1.442695, %v690_v50  ;;  %v1361_v53 = vmul.f32 -1.442695, %v691_v51 }
 0x956   :  { %1623 = vpow2.f32 %v1360_v52 }
 0x957   :  { %1625 = vpow2.f32 %v1361_v53 }
 0x960   :  { %v1624_v54 = vpop.eup %1623 }
 0x961   :  { %v1626_v55 = vpop.eup %1625  ;;  %v698_v56 = vadd.f32 1.0, %v1624_v54 }
 0x962   :  { %v699_v57 = vadd.f32 1.0, %v1626_v55 }
 0x963   :  { %1627 = vrcp.f32 %v698_v56 }
 0x964   :  { %1629 = vrcp.f32 %v699_v57 }
 0x96d   :  { %v1628_v58 = vpop.eup %1627 }
 0x96e   :  { %v1630_v59 = vpop.eup %1629  ;;  %v724_v13 = vsub.f32 1.0, %v1628_v58  ;;  %v740_v19 = vmul.f32 %v1628_v58, %v736_v15 }
 0x96f   :  { %v725_v9 = vsub.f32 1.0, %v1630_v59  ;;  %v741_v16 = vmul.f32 %v1630_v59, %v737_v10 }
 0x9c4   :  { %v707_v60 = vpop.permute.xlu0 %706  ;;  %v705_v61 = vpop.permute.xlu1 %704 }
 0x9c5   :  { %v711_v62 = vmul.f32 %v1630_v59, %v707_v60  ;;  %v710_v63 = vmul.f32 %v1628_v58, %v705_v61 }
 0x9c7   :  { %716 = vrot.lane.b32.xlu0 %v711_v62, %s1762_s13  ;;  %714 = vrot.lane.b32.xlu1 %v710_v63, %s1762_s13 }
 0xa39   :  { %v717_v2 = vpop.permute.xlu0 %716  ;;  %v715_v3 = vpop.permute.xlu1 %714 }
 0xa3a   :  { %v721_v4 = vadd.f32 %v717_v2, %v1896_v38  ;;  %v720_v6 = vadd.f32 %v715_v3, %v1898_v39 }
 0xa3c   :  { %1631 = vtanh.f32 %v721_v4 }
 0xa3d   :  { %1633 = vtanh.f32 %v720_v6 }
 0xa46   :  { %v1632_v7 = vpop.eup %1631 }
 0xa47   :  { %v1634_v8 = vpop.eup %1633  ;;  %730 = vrot.lane.b32.xlu0 %v1632_v7, %s1764_s5 }
 0xa48   :  { %728 = vrot.lane.b32.xlu1 %v1634_v8, %s1764_s5 }
 0xab9   :  { %v731_v12 = vpop.permute.xlu0 %730 }
 0xaba   :  { %v735_v17 = vmul.f32 %v731_v12, %v725_v9  ;;  %v729_v18 = vpop.permute.xlu1 %728 }
 0xabb   :  { %v734_v20 = vmul.f32 %v729_v18, %v724_v13 }
 0xabc   :  { %v743_v21 = vadd.f32 %v741_v16, %v735_v17 }
 0xabd   :  { %v742_v22 = vadd.f32 %v740_v19, %v734_v20 }
 0xabe   :  { %v1987_v24 = vsel %vm1302_vm6, %v1962_v41, %v743_v21  ;;  %v747_v25 = vrot.slane %v743_v21, 2  ;;  %v875_v57 = vrot.slane %v743_v21, 7 }
 0xabf   :  { %v1990_v26 = vsel %vm1302_vm6, %v1964_v43, %v742_v22  ;;  %v746_v27 = vrot.slane %v742_v22, 3  ;;  %v874_v60 = vrot.slane %v742_v22, 7 }
 0xac1   :  { %v748_v28 = vsel %vm336_vm3, %v747_v25, %v746_v27 }
 0xac2   :  { %749 = vrot.lane.b32.xlu1 %v748_v28, %s1764_s5 }
 0xb34   :  { %v750_v29 = vpop.permute.xlu1 %749 }
 0xb35   :  { %1484 = vmatmul.mubr.msk.f32.vlgmr.msra.gmra.mrb[4].mxu1 %vm105_vm1, %v750_v29 }
 0xb36   :  { %1565 = vmatpush3.bf16.msra.mxu1 %v1855_v14  ;;  %1505 = vmatprep.mubr.msk.f32.mxu1 %vm1759_vm0, %v1760_v1 }
 0xb37   :  { %1566 = vmatprep.subr.bf16.mxu1 %v1758_v0 }
 0xb3a   :  { %1568 = vmatpush3.bf16.msra.mxu1 %v1864_v23 }
 0xc08   :  { %v819_v30 = vpop.f32.mrb[4].mxu1 }
 0xc09   :  { %v820_v31 = vadd.f32 %v1888_v32, %v819_v30  ;;  %v1485_v33 = vpop.f32.mrb[5].mxu1 }
 0xc0b   :  { %v824_v34 = vrot.slane %v820_v31, 4  ;;  %v825_v35 = vrot.slane %v820_v31, 5 }
 0xc0d   :  { %844 = vrot.lane.b32.xlu1 %v825_v35, %s1762_s13  ;;  %842 = vrot.lane.b32.xlu0 %v824_v34, %s1762_s13  ;;  %v828_v36 = vadd.f32 %v824_v34, %v1898_v39  ;;  %v829_v37 = vadd.f32 %v825_v35, %v1896_v38 }
 0xc0f   :  { %v1363_v40 = vmul.f32 -1.442695, %v828_v36  ;;  %v1364_v41 = vmul.f32 -1.442695, %v829_v37 }
 0xc11   :  { %1635 = vpow2.f32 %v1363_v40 }
 0xc12   :  { %1637 = vpow2.f32 %v1364_v41 }
 0xc1b   :  { %v1636_v42 = vpop.eup %1635 }
 0xc1c   :  { %v1638_v43 = vpop.eup %1637  ;;  %v836_v44 = vadd.f32 1.0, %v1636_v42 }
 0xc1d   :  { %v837_v45 = vadd.f32 1.0, %v1638_v43 }
 0xc1e   :  { %1639 = vrcp.f32 %v836_v44 }
 0xc1f   :  { %1641 = vrcp.f32 %v837_v45 }
 0xc28   :  { %v1640_v46 = vpop.eup %1639 }
 0xc29   :  { %v1642_v5 = vpop.eup %1641  ;;  %v862_v59 = vsub.f32 1.0, %v1640_v46  ;;  %v878_v2 = vmul.f32 %v1640_v46, %v874_v60 }
 0xc2a   :  { %v863_v56 = vsub.f32 1.0, %v1642_v5  ;;  %v879_v61 = vmul.f32 %v1642_v5, %v875_v57 }
 0xc7f   :  { %v845_v11 = vpop.permute.xlu1 %844  ;;  %v843_v47 = vpop.permute.xlu0 %842 }
 0xc80   :  { %v849_v48 = vmul.f32 %v1642_v5, %v845_v11  ;;  %v848_v49 = vmul.f32 %v1640_v46, %v843_v47 }
 0xc82   :  { %854 = vrot.lane.b32.xlu1 %v849_v48, %s1762_s13  ;;  %852 = vrot.lane.b32.xlu0 %v848_v49, %s1762_s13 }
 0xcf4   :  { %v855_v50 = vpop.permute.xlu1 %854  ;;  %v853_v51 = vpop.permute.xlu0 %852 }
 0xcf5   :  { %v859_v52 = vadd.f32 %v855_v50, %v1896_v38  ;;  %v858_v53 = vadd.f32 %v853_v51, %v1898_v39 }
 0xcf7   :  { %1643 = vtanh.f32 %v859_v52 }
 0xcf8   :  { %1645 = vtanh.f32 %v858_v53 }
 0xd01   :  { %v1644_v54 = vpop.eup %1643 }
 0xd02   :  { %v1646_v55 = vpop.eup %1645  ;;  %868 = vrot.lane.b32.xlu1 %v1644_v54, %s1764_s5 }
 0xd03   :  { %866 = vrot.lane.b32.xlu0 %v1646_v55, %s1764_s5 }
 0xd74   :  { %v869_v58 = vpop.permute.xlu1 %868 }
 0xd75   :  { %v873_v62 = vmul.f32 %v869_v58, %v863_v56  ;;  %v867_v63 = vpop.permute.xlu0 %866 }
 0xd76   :  { %v872_v3 = vmul.f32 %v867_v63, %v862_v59 }
 0xd77   :  { %v881_v4 = vadd.f32 %v879_v61, %v873_v62 }
 0xd78   :  { %v880_v6 = vadd.f32 %v878_v2, %v872_v3 }
 0xd79   :  { %v2012_v7 = vsel %vm1305_vm7, %v1987_v24, %v881_v4  ;;  %v885_v8 = vrot.slane %v881_v4, 3  ;;  %v1013_v41 = vrot.slane %v881_v4, 7 }
 0xd7a   :  { %v2015_v9 = vsel %vm1305_vm7, %v1990_v26, %v880_v6  ;;  %v884_v10 = vrot.slane %v880_v6, 4  ;;  %v1012_v44 = vrot.slane %v880_v6, 7 }
 0xd7c   :  { %v886_v12 = vsel %vm336_vm3, %v885_v8, %v884_v10 }
 0xd7d   :  { %887 = vrot.lane.b32.xlu0 %v886_v12, %s1764_s5 }
 0xdef   :  { %v888_v13 = vpop.permute.xlu0 %887 }
 0xdf0   :  { %1495 = vmatmul.mubr.msk.f32.vlgmr.msra.gmra.mrb[6].mxu0 %vm105_vm1, %v888_v13 }
 0xdf1   :  { %1571 = vmatpush3.bf16.msra.mxu0 %v1855_v14  ;;  %1516 = vmatprep.mubr.msk.f32.mxu0 %vm1759_vm0, %v1760_v1 }
 0xdf2   :  { %1572 = vmatprep.subr.bf16.mxu0 %v1758_v0 }
 0xdf5   :  { %1574 = vmatpush3.bf16.msra.mxu0 %v1864_v23 }
 0xec3   :  { %v957_v15 = vpop.f32.mrb[6].mxu0 }
 0xec4   :  { %v958_v16 = vadd.f32 %v1888_v32, %v957_v15  ;;  %v1496_v17 = vpop.f32.mrb[7].mxu0 }
 0xec6   :  { %v962_v18 = vrot.slane %v958_v16, 3  ;;  %v963_v19 = vrot.slane %v958_v16, 4 }
 0xec8   :  { %982 = vrot.lane.b32.xlu0 %v963_v19, %s1762_s13  ;;  %980 = vrot.lane.b32.xlu1 %v962_v18, %s1762_s13  ;;  %v966_v20 = vadd.f32 %v962_v18, %v1898_v39  ;;  %v967_v14 = vadd.f32 %v963_v19, %v1896_v38 }
 0xeca   :  { %v1366_v21 = vmul.f32 -1.442695, %v966_v20  ;;  %v1367_v1 = vmul.f32 -1.442695, %v967_v14 }
 0xecc   :  { %1647 = vpow2.f32 %v1366_v21 }
 0xecd   :  { %1649 = vpow2.f32 %v1367_v1 }
 0xed6   :  { %v1648_v0 = vpop.eup %1647 }
 0xed7   :  { %v1650_v23 = vpop.eup %1649  ;;  %v974_v22 = vadd.f32 1.0, %v1648_v0 }
 0xed8   :  { %v975_v24 = vadd.f32 1.0, %v1650_v23 }
 0xed9   :  { %1651 = vrcp.f32 %v974_v22 }
 0xeda   :  { %1653 = vrcp.f32 %v975_v24 }
 0xee3   :  { %v1652_v25 = vpop.eup %1651 }
 0xee4   :  { %v1654_v26 = vpop.eup %1653  ;;  %v1000_v43 = vsub.f32 1.0, %v1652_v25  ;;  %v1016_v11 = vmul.f32 %v1652_v25, %v1012_v44 }
 0xee5   :  { %v1001_v40 = vsub.f32 1.0, %v1654_v26  ;;  %v1017_v45 = vmul.f32 %v1654_v26, %v1013_v41 }
 0xf3a   :  { %v983_v27 = vpop.permute.xlu0 %982  ;;  %v981_v28 = vpop.permute.xlu1 %980 }
 0xf3b   :  { %v987_v29 = vmul.f32 %v1654_v26, %v983_v27  ;;  %v986_v30 = vmul.f32 %v1652_v25, %v981_v28 }
 0xf3d   :  { %992 = vrot.lane.b32.xlu0 %v987_v29, %s1762_s13  ;;  %990 = vrot.lane.b32.xlu1 %v986_v30, %s1762_s13 }
 0xfaf   :  { %v993_v31 = vpop.permute.xlu0 %992  ;;  %v991_v33 = vpop.permute.xlu1 %990 }
 0xfb0   :  { %v997_v34 = vadd.f32 %v993_v31, %v1896_v38  ;;  %v996_v35 = vadd.f32 %v991_v33, %v1898_v39 }
 0xfb2   :  { %1655 = vtanh.f32 %v997_v34 }
 0xfb3   :  { %1657 = vtanh.f32 %v996_v35 }
 0xfbc   :  { %v1656_v36 = vpop.eup %1655 }
 0xfbd   :  { %v1658_v37 = vpop.eup %1657  ;;  %1006 = vrot.lane.b32.xlu0 %v1656_v36, %s1764_s5 }
 0xfbe   :  { %1004 = vrot.lane.b32.xlu1 %v1658_v37, %s1764_s5 }
0x102f   :  { %v1007_v42 = vpop.permute.xlu0 %1006 }
0x1030   :  { %v1011_v46 = vmul.f32 %v1007_v42, %v1001_v40  ;;  %v1005_v5 = vpop.permute.xlu1 %1004 }
0x1031   :  { %v1010_v47 = vmul.f32 %v1005_v5, %v1000_v43 }
0x1032   :  { %v1019_v48 = vadd.f32 %v1017_v45, %v1011_v46 }
0x1033   :  { %v1018_v49 = vadd.f32 %v1016_v11, %v1010_v47 }
0x1034   :  { %v1023_v50 = vrot.slane %v1019_v48, 4  ;;  %v1310_v51 = vsel %vm1308_vm8, %v2012_v7, %v1019_v48  ;;  %v1151_v1 = vrot.slane %v1019_v48, 7 }
0x1035   :  { %v1022_v52 = vrot.slane %v1018_v49, 5  ;;  %v1309_v53 = vsel %vm1308_vm8, %v2015_v9, %v1018_v49  ;;  %v1150_v22 = vrot.slane %v1018_v49, 7 }
0x1037   :  { %v1024_v54 = vsel %vm336_vm3, %v1023_v50, %v1022_v52 }
0x1038   :  { %1025 = vrot.lane.b32.xlu1 %v1024_v54, %s1764_s5 }
0x10aa   :  { %v1026_v55 = vpop.permute.xlu1 %1025 }
0x10ab   :  { %1506 = vmatmul.mubr.msk.f32.vlgmr.msra.gmra.mrb[6].mxu1 %vm105_vm1, %v1026_v55 }
0x117e   :  { %v1095_v56 = vpop.f32.mrb[6].mxu1 }
0x117f   :  { %v1096_v57 = vadd.f32 %v1888_v32, %v1095_v56  ;;  %v1507_v58 = vpop.f32.mrb[7].mxu1 }
0x1181   :  { %v1100_v59 = vrot.slane %v1096_v57, 2  ;;  %v1101_v60 = vrot.slane %v1096_v57, 3 }
0x1183   :  { %1120 = vrot.lane.b32.xlu1 %v1101_v60, %s1762_s13  ;;  %1118 = vrot.lane.b32.xlu0 %v1100_v59, %s1762_s13  ;;  %v1104_v61 = vadd.f32 %v1100_v59, %v1898_v39  ;;  %v1105_v62 = vadd.f32 %v1101_v60, %v1896_v38 }
0x1185   :  { %v1369_v63 = vmul.f32 -1.442695, %v1104_v61  ;;  %v1370_v2 = vmul.f32 -1.442695, %v1105_v62 }
0x1187   :  { %1659 = vpow2.f32 %v1369_v63 }
0x1188   :  { %1661 = vpow2.f32 %v1370_v2 }
0x1191   :  { %v1660_v3 = vpop.eup %1659 }
0x1192   :  { %v1662_v4 = vpop.eup %1661  ;;  %v1112_v6 = vadd.f32 1.0, %v1660_v3 }
0x1193   :  { %v1113_v7 = vadd.f32 1.0, %v1662_v4 }
0x1194   :  { %1663 = vrcp.f32 %v1112_v6 }
0x1195   :  { %1665 = vrcp.f32 %v1113_v7 }
0x119e   :  { %v1664_v8 = vpop.eup %1663 }
0x119f   :  { %v1666_v9 = vpop.eup %1665  ;;  %v1138_v23 = vsub.f32 1.0, %v1664_v8  ;;  %v1154_v27 = vmul.f32 %v1664_v8, %v1150_v22 }
0x11a0   :  { %v1139_v21 = vsub.f32 1.0, %v1666_v9  ;;  %v1155_v24 = vmul.f32 %v1666_v9, %v1151_v1 }
0x11f5   :  { %v1121_v10 = vpop.permute.xlu1 %1120  ;;  %v1119_v12 = vpop.permute.xlu0 %1118 }
0x11f6   :  { %v1125_v13 = vmul.f32 %v1666_v9, %v1121_v10  ;;  %v1124_v15 = vmul.f32 %v1664_v8, %v1119_v12 }
0x11f8   :  { %1130 = vrot.lane.b32.xlu1 %v1125_v13, %s1762_s13  ;;  %1128 = vrot.lane.b32.xlu0 %v1124_v15, %s1762_s13 }
0x126a   :  { %v1131_v16 = vpop.permute.xlu1 %1130  ;;  %v1129_v17 = vpop.permute.xlu0 %1128 }
0x126b   :  { %v1135_v18 = vadd.f32 %v1131_v16, %v1896_v38  ;;  %v1134_v19 = vadd.f32 %v1129_v17, %v1898_v39 }
0x126d   :  { %1667 = vtanh.f32 %v1135_v18 }
0x126e   :  { %1669 = vtanh.f32 %v1134_v19 }
0x1277   :  { %v1668_v20 = vpop.eup %1667 }
0x1278   :  { %v1670_v14 = vpop.eup %1669  ;;  %1144 = vrot.lane.b32.xlu1 %v1668_v20, %s1764_s5 }
0x1279   :  { %1142 = vrot.lane.b32.xlu0 %v1670_v14, %s1764_s5 }
0x12ea   :  { %v1145_v0 = vpop.permute.xlu1 %1144 }
0x12eb   :  { %v1149_v25 = vmul.f32 %v1145_v0, %v1139_v21  ;;  %v1143_v26 = vpop.permute.xlu0 %1142 }
0x12ec   :  { %v1148_v28 = vmul.f32 %v1143_v26, %v1138_v23 }
0x12ed   :  { %v1157_v29 = vadd.f32 %v1155_v24, %v1149_v25 }
0x12ee   :  { %v1156_v30 = vadd.f32 %v1154_v27, %v1148_v28 }
0x12ef   :  { %v1161_v31 = vrot.slane %v1157_v29, 5  ;;  %v1313_v33 = vsel %vm1311_vm9, %v1310_v51, %v1157_v29  ;;  %v1289_v63 = vrot.slane %v1157_v29, 7 }
0x12f0   :  { %v1160_v34 = vrot.slane %v1156_v30, 6  ;;  %v1312_v35 = vsel %vm1311_vm9, %v1309_v53, %v1156_v30  ;;  %v1288_v4 = vrot.slane %v1156_v30, 7 }
0x12f2   :  { %v1162_v36 = vsel %vm336_vm3, %v1161_v31, %v1160_v34 }
0x12f3   :  { %1163 = vrot.lane.b32.xlu0 %v1162_v36, %s1764_s5 }
0x1365   :  { %v1164_v37 = vpop.permute.xlu0 %1163 }
0x1366   :  { %1517 = vmatmul.mubr.msk.f32.vlgmr.msra.gmra.mrb[8].mxu0 %vm105_vm1, %v1164_v37 }
0x1439   :  { %v1233_v40 = vpop.f32.mrb[8].mxu0 }
0x143a   :  { %v1234_v41 = vadd.f32 %v1888_v32, %v1233_v40  ;;  %v1518_v42 = vpop.f32.mrb[9].mxu0 }
0x143c   :  { %v1238_v43 = vrot.slane %v1234_v41, 1  ;;  %v1239_v44 = vrot.slane %v1234_v41, 2 }
0x143e   :  { %1258 = vrot.lane.b32.xlu1 %v1239_v44, %s1762_s13  ;;  %1256 = vrot.lane.b32.xlu0 %v1238_v43, %s1762_s13  ;;  %v1242_v45 = vadd.f32 %v1238_v43, %v1898_v39  ;;  %v1243_v46 = vadd.f32 %v1239_v44, %v1896_v38 }
0x1440   :  { %v1372_v5 = vmul.f32 -1.442695, %v1242_v45  ;;  %v1373_v11 = vmul.f32 -1.442695, %v1243_v46 }
0x1442   :  { %1671 = vpow2.f32 %v1372_v5 }
0x1443   :  { %1673 = vpow2.f32 %v1373_v11 }
0x144c   :  { %v1672_v47 = vpop.eup %1671 }
0x144d   :  { %v1674_v48 = vpop.eup %1673  ;;  %v1250_v49 = vadd.f32 1.0, %v1672_v47 }
0x144e   :  { %v1251_v50 = vadd.f32 1.0, %v1674_v48 }
0x144f   :  { %1675 = vrcp.f32 %v1250_v49 }
0x1450   :  { %1677 = vrcp.f32 %v1251_v50 }
0x1459   :  { %v1676_v32 = vpop.eup %1675 }
0x145a   :  { %v1678_v51 = vpop.eup %1677  ;;  %v1276_v3 = vsub.f32 1.0, %v1676_v32  ;;  %v1292_v9 = vmul.f32 %v1676_v32, %v1288_v4 }
0x145b   :  { %v1277_v62 = vsub.f32 1.0, %v1678_v51  ;;  %v1293_v6 = vmul.f32 %v1678_v51, %v1289_v63 }
0x14b0   :  { %v1259_v52 = vpop.permute.xlu1 %1258  ;;  %v1257_v53 = vpop.permute.xlu0 %1256 }
0x14b1   :  { %v1263_v54 = vmul.f32 %v1678_v51, %v1259_v52  ;;  %v1262_v55 = vmul.f32 %v1676_v32, %v1257_v53 }
0x14b3   :  { %1268 = vrot.lane.b32.xlu1 %v1263_v54, %s1762_s13  ;;  %1266 = vrot.lane.b32.xlu0 %v1262_v55, %s1762_s13 }
0x1525   :  { %v1269_v56 = vpop.permute.xlu1 %1268  ;;  %v1267_v57 = vpop.permute.xlu0 %1266 }
0x1526   :  { %v1273_v58 = vadd.f32 %v1269_v56, %v1896_v38  ;;  %v1272_v59 = vadd.f32 %v1267_v57, %v1898_v39 }
0x1528   :  { %1679 = vtanh.f32 %v1273_v58 }
0x1529   :  { %1681 = vtanh.f32 %v1272_v59 }
0x1532   :  { %v1680_v60 = vpop.eup %1679 }
0x1533   :  { %v1682_v61 = vpop.eup %1681  ;;  %1282 = vrot.lane.b32.xlu1 %v1680_v60, %s1764_s5 }
0x1534   :  { %1280 = vrot.lane.b32.xlu0 %v1682_v61, %s1764_s5 }
0x15a5   :  { %v1283_v2 = vpop.permute.xlu1 %1282 }
0x15a6   :  { %v1287_v7 = vmul.f32 %v1283_v2, %v1277_v62  ;;  %v1281_v8 = vpop.permute.xlu0 %1280 }
0x15a7   :  { %v1286_v38 = vmul.f32 %v1281_v8, %v1276_v3 }
0x15a8   :  { %v1295_v39 = vadd.f32 %v1293_v6, %v1287_v7 }
0x15a9   :  { %v1294_v10 = vadd.f32 %v1292_v9, %v1286_v38 }
0x15aa   :  { %v1316_v12 = vsel %vm1314_vm10, %v1313_v33, %v1295_v39  ;;  %v1329_v15 = vrot.slane %v1295_v39, 7 }
0x15ab   :  { %1321 = vrot.lane.b32.xlu0 %v1316_v12, %s1764_s5  ;;  %v1315_v13 = vsel %vm1314_vm10, %v1312_v35, %v1294_v10 }
0x15ac   :  { %1319 = vrot.lane.b32.xlu1 %v1315_v13, %s1764_s5 }
0x15af   :  { %1332 = vrot.lane.b32.xlu0 %v1329_v15, %s1764_s5 }
0x15b0   :  { %1330 = vrot.lane.b32.xlu1 %v1294_v10, %s1764_s5 }
0x161d   :  { %v1322_v16 = vpop.permute.xlu0 %1321 }
0x161e   :  { %v1320_v17 = vpop.permute.xlu1 %1319  ;;  %1326 = vst.msk [vmem:[%s2084_s6 + $0x8] sm:$0xff] %vm105_vm1, %v1322_v16 }
0x161f   :  { %1325 = vst.msk [vmem:[%s2084_s6] sm:$0xff] %vm105_vm1, %v1320_v17 }
0x1621   :  { %v1333_v18 = vpop.permute.xlu0 %1332 }
0x1622   :  { %v1331_v19 = vpop.permute.xlu1 %1330  ;;  %1339 = vst.msk [vmem:[#allocation2 + $0x1] sm:$0x1] %vm1338_vm11, %v1333_v18 }
0x1623   :  { %1337 = vst.msk [vmem:[#allocation2 - $0x7] sm:$0x80] %vm1336_vm12, %v1331_v19 }
0x1624   :  { %1344 = vsyncpa [#allocation4], 1 }
0x1625   :  { %1345 = vsyncpa [#allocation6], 1 }

</bundles_post_ra>
